<compile_context>
chip_gen: v7x
topology: tpu7x:2x2x1
jax: 0.10.0
libtpu: 0.0.40
codegen_flags: <defaults>
</compile_context>

<pallas_src>
import functools

import jax
import jax.numpy as jnp
from jax.experimental import pallas as pl
from jax.experimental.pallas import tpu as pltpu


def bottleneck_kernel(x_ref, mask_ref, w1_ref, s1_ref, b1_ref,
                      w2_ref, s2_ref, b2_ref,
                      w3_ref, s3_ref, b3_ref,
                      out_ref, *, wp):
    """Fused Bottleneck on a flat, spatially zero-padded pixel slab.

    x_ref    : (Pext, Cin)  f32  extended slab: per-image zero-padded (H+2,W+2)
                                 images flattened row-major, plus (W+3) extra
                                 zero rows at top and bottom so every 3x3 tap
                                 shift is an in-bounds static slice.
    mask_ref : (Pext, width) f32 1.0 on true image pixels, 0.0 on padding rows.
    w1_ref   : (Cin, width)      bf16  1x1 conv weight
    w2_ref   : (9*width, width)  bf16  3x3 conv weight, im2col layout (ky,kx,ci)
    w3_ref   : (width, Cout)     bf16  1x1 conv weight
    s*_ref/b*_ref : (1, C)  f32  folded eval-mode BatchNorm scale / bias
    out_ref  : (Ppad, Cout) result at every padded position (border rows are
                                 garbage and are sliced away by the wrapper)
    wp       : padded image width (W + 2), static.
    """
    ppad, _ = out_ref.shape
    ext = wp + 1
    bf16 = jnp.bfloat16

    x = x_ref[...]                                    # (Pext, Cin) f32
    mask = mask_ref[...]                              # (Pext, width) f32
    s1 = s1_ref[...]; b1 = b1_ref[...]                # hoisted BN reads
    s2 = s2_ref[...]; b2 = b2_ref[...]
    s3 = s3_ref[...]; b3 = b3_ref[...]

    # ---- conv1x1 + BN1 + ReLU  (mask keeps zero-padding rows exactly 0) ----
    h1 = jnp.dot(x.astype(bf16), w1_ref[...],
                 preferred_element_type=jnp.float32)
    h1 = jnp.maximum(h1 * s1 + b1, 0.0) * mask        # (Pext, width) f32

    # ---- conv3x3 (stride 1, pad 1) as ONE im2col matmul, K = 9*width ----
    # Output at padded flat position i needs input row i + dy*wp + dx of the
    # extended slab (dy, dx in 0..2); all slices are static and in-bounds.
    cols = jnp.concatenate(
        [h1[dy * wp + dx: dy * wp + dx + ppad, :]
         for dy in range(3) for dx in range(3)],
        axis=1)                                        # (Ppad, 9*width)
    acc2 = jnp.dot(cols.astype(bf16), w2_ref[...],
                   preferred_element_type=jnp.float32)
    h2 = jnp.maximum(acc2 * s2 + b2, 0.0)              # (Ppad, width)

    # ---- conv1x1 + BN3, identity residual, ReLU ----
    h3 = jnp.dot(h2.astype(bf16), w3_ref[...],
                 preferred_element_type=jnp.float32)
    h3 = h3 * s3 + b3
    out = jnp.maximum(h3 + x[ext:ext + ppad, :], 0.0)  # residual add in f32
    out_ref[...] = out.astype(out_ref.dtype)


def bottleneck_forward_nhwc(x_nhwc, params):
    """Recommended entry point: NHWC in, NHWC out (no layout transposes)."""
    w1, s1, b1, w2, s2, b2, w3, s3, b3 = params
    n, h, w, cin = x_nhwc.shape
    width = w1.shape[1]
    cout = w3.shape[1]
    if cin != cout:
        raise ValueError(
            "Bottleneck with downsample=None needs inplanes == planes*4 "
            f"(got Cin={cin}, Cout={cout}).")

    hp, wp = h + 2, w + 2
    ppad = n * hp * wp            # all padded pixel positions
    ext = wp + 1                  # extra zero rows so all 9 shifts are in-bounds
    pext = ppad + 2 * ext

    # NOTE (scaling): this toy slab is < 1 MiB so the whole batch fits one grid
    # step.  For real ResNet shapes, block the batch (or pixel rows with a
    # 1-row halo) over a "parallel" grid axis and size blocks against v7x's
    # 64 MiB VMEM (vs 128 MiB on v5e/v6e), raising vmem_limit_bytes if needed.

    x32 = x_nhwc.astype(jnp.float32)
    x_pad = jnp.pad(x32, ((0, 0), (1, 1), (1, 1), (0, 0)))       # (N,Hp,Wp,Cin)
    x_ext = jnp.pad(x_pad.reshape(ppad, cin), ((ext, ext), (0, 0)))

    # Interior mask (1 at real pixels, 0 at spatial padding / extension rows),
    # pre-broadcast to `width` lanes so the kernel does a plain multiply.
    m = jnp.zeros((n, hp, wp), jnp.float32).at[:, 1:h + 1, 1:w + 1].set(1.0)
    mask = jnp.pad(m.reshape(ppad), (ext, ext))[:, None]
    mask = jnp.broadcast_to(mask, (pext, width)).astype(jnp.float32)

    bf16 = jnp.bfloat16
    w1b = w1.astype(bf16)
    w2b = w2.reshape(9 * width, width).astype(bf16)   # (ky,kx,ci) -> rows
    w3b = w3.astype(bf16)

    flops = 2 * (pext * cin * width
                 + ppad * (9 * width) * width
                 + ppad * width * cout)
    bytes_accessed = (4 * (x_ext.size + mask.size + ppad * cout
                           + s1.size + b1.size + s2.size + b2.size
                           + s3.size + b3.size)
                      + 2 * (w1b.size + w2b.size + w3b.size))
    cost = pl.CostEstimate(flops=int(flops), transcendentals=0,
                           bytes_accessed=int(bytes_accessed))

    def full_spec(shape):
        nd = len(shape)
        return pl.BlockSpec(shape, lambda i, _nd=nd: (0,) * _nd)

    operands = (x_ext, mask, w1b, s1, b1, w2b, s2, b2, w3b, s3, b3)

    out2d = pl.pallas_call(
        functools.partial(bottleneck_kernel, wp=wp),
        out_shape=jax.ShapeDtypeStruct((ppad, cout), x_nhwc.dtype),
        grid=(1,),
        in_specs=[full_spec(a.shape) for a in operands],
        out_specs=pl.BlockSpec((ppad, cout), lambda i: (0, 0)),
        compiler_params=pltpu.CompilerParams(
            dimension_semantics=("parallel",)),
        cost_estimate=cost,
    )(*operands)

    # Drop the spatial border rows; reshape back to NHWC.
    return out2d.reshape(n, hp, wp, cout)[:, 1:h + 1, 1:w + 1, :]


def bottleneck_forward_nchw(x_nchw, params):
    """PyTorch-layout parity wrapper.

    In a real network keep activations NHWC end-to-end and call
    bottleneck_forward_nhwc directly: these two transposes are full-tensor HBM
    round trips that dwarf the kernel itself at small sizes.
    """
    x_nhwc = jnp.transpose(x_nchw, (0, 2, 3, 1))
    out = bottleneck_forward_nhwc(x_nhwc, params)
    return jnp.transpose(out, (0, 3, 1, 2))


def make_params(key, inplanes, planes, dtype=jnp.float32):
    """Deterministic synthetic weights + eval-mode BN folded to scale/bias."""
    expansion = 4
    width = planes                 # base_width=64, groups=1 -> width == planes
    cout = planes * expansion
    keys = jax.random.split(key, 15)

    def conv_w(k, shape, fan_in):
        return jax.random.normal(k, shape, dtype) / jnp.sqrt(
            jnp.asarray(fan_in, dtype))

    w1 = conv_w(keys[0], (inplanes, width), inplanes)            # conv1x1
    w2 = conv_w(keys[1], (3, 3, width, width), 9 * width)        # conv3x3 HWIO
    w3 = conv_w(keys[2], (width, cout), width)                   # conv1x1

    def bn_fold(kg, kb, km, kv, c):
        gamma = 1.0 + 0.1 * jax.random.normal(kg, (c,), dtype)
        beta = 0.1 * jax.random.normal(kb, (c,), dtype)
        running_mean = 0.1 * jax.random.normal(km, (c,), dtype)
        running_var = jnp.abs(jax.random.normal(kv, (c,), dtype)) + 0.5
        eps = 1e-5
        scale = gamma / jnp.sqrt(running_var + eps)
        bias = beta - running_mean * scale
        return scale.reshape(1, c), bias.reshape(1, c)

    s1, b1 = bn_fold(keys[3], keys[4], keys[5], keys[6], width)
    s2, b2 = bn_fold(keys[7], keys[8], keys[9], keys[10], width)
    s3, b3 = bn_fold(keys[11], keys[12], keys[13], keys[14], cout)
    return (w1, s1, b1, w2, s2, b2, w3, s3, b3)


def reference_nchw(x_nchw, params, matmul_dtype=jnp.float32):
    """Pure-JAX reference (folded-BN eval semantics).

    matmul_dtype controls the conv/matmul operand precision (f32 accumulation),
    allowing an exact-numerics comparison against the bf16 MXU kernel.
    """
    w1, s1, b1, w2, s2, b2, w3, s3, b3 = params
    f32 = jnp.float32
    x = jnp.transpose(x_nchw, (0, 2, 3, 1)).astype(f32)           # NHWC
    h = jnp.einsum('nhwc,cd->nhwd', x.astype(matmul_dtype),
                   w1.astype(matmul_dtype), preferred_element_type=f32)
    h = jax.nn.relu(h * s1[0] + b1[0])
    h = jax.lax.conv_general_dilated(
        h.astype(matmul_dtype), w2.astype(matmul_dtype),
        window_strides=(1, 1), padding='SAME',
        dimension_numbers=('NHWC', 'HWIO', 'NHWC'),
        preferred_element_type=f32)
    h = jax.nn.relu(h * s2[0] + b2[0])
    h = jnp.einsum('nhwc,cd->nhwd', h.astype(matmul_dtype),
                   w3.astype(matmul_dtype), preferred_element_type=f32)
    h = h * s3[0] + b3[0]
    out = jax.nn.relu(h + x)
    return jnp.transpose(out, (0, 3, 1, 2))                       # NCHW


if __name__ == "__main__":
    # Small Bottleneck: inplanes=32, planes=8 -> width=8, out_channels=32
    # (inplanes == planes*expansion, so downsample=None identity add is valid).
    # NOTE: real ResNet widths (>=64 channels) are the representative perf case;
    # these toy channel counts under-fill the 128-wide lane dimension.
    N, inplanes, planes, H, W = 2, 32, 8, 8, 8

    key = jax.random.PRNGKey(0)
    k_x, k_p = jax.random.split(key)
    x_nchw = jax.random.normal(k_x, (N, inplanes, H, W), jnp.float32)
    params = make_params(k_p, inplanes, planes)

    out = bottleneck_forward_nchw(x_nchw, params)
    out = jax.block_until_ready(out)
    assert out.shape == (N, planes * 4, H, W)

    # Tight check vs a reference with identical numerics (bf16 operands,
    # f32 accumulation) -- validates the kernel's indexing/structure exactly.
    ref_bf16 = reference_nchw(x_nchw, params, matmul_dtype=jnp.bfloat16)
    assert jnp.allclose(out, ref_bf16, atol=2e-3, rtol=2e-3), \
        "mismatch vs bf16-matched JAX reference"

    # Loose check vs the pure-f32 reference (only bf16 MXU rounding differs).
    ref_f32 = reference_nchw(x_nchw, params, matmul_dtype=jnp.float32)
    assert jnp.allclose(out, ref_f32, atol=1e-1, rtol=1e-1), \
        "mismatch vs f32 JAX reference"

    print("KERNEL_OK")
</pallas_src>

<mosaic_0001>
module attributes {stable_mosaic.version = 11 : i64} {
  func.func @bottleneck_kernel(%arg0: i32, %arg1: memref<222x32xf32, #tpu.memory_space<vmem>>, %arg2: memref<222x8xf32, #tpu.memory_space<vmem>>, %arg3: memref<32x8xbf16, #tpu.memory_space<vmem>>, %arg4: memref<1x8xf32, #tpu.memory_space<vmem>>, %arg5: memref<1x8xf32, #tpu.memory_space<vmem>>, %arg6: memref<72x8xbf16, #tpu.memory_space<vmem>>, %arg7: memref<1x8xf32, #tpu.memory_space<vmem>>, %arg8: memref<1x8xf32, #tpu.memory_space<vmem>>, %arg9: memref<8x32xbf16, #tpu.memory_space<vmem>>, %arg10: memref<1x32xf32, #tpu.memory_space<vmem>>, %arg11: memref<1x32xf32, #tpu.memory_space<vmem>>, %arg12: memref<200x32xf32, #tpu.memory_space<vmem>>) attributes {dimension_semantics = [#tpu.dimension_semantics<parallel>], iteration_bounds = array<i64: 1>, scalar_prefetch = 0 : i64, scratch_operands = 0 : i64, tpu.core_type = #tpu.core_type<tc>, window_params = [{pipeline_mode = #tpu.pipeline_mode<synchronous>, transform_indices = @transform_0, window_bounds = array<i64: 222, 32>}, {pipeline_mode = #tpu.pipeline_mode<synchronous>, transform_indices = @transform_1, window_bounds = array<i64: 222, 8>}, {pipeline_mode = #tpu.pipeline_mode<synchronous>, transform_indices = @transform_2, window_bounds = array<i64: 32, 8>}, {pipeline_mode = #tpu.pipeline_mode<synchronous>, transform_indices = @transform_3, window_bounds = array<i64: 1, 8>}, {pipeline_mode = #tpu.pipeline_mode<synchronous>, transform_indices = @transform_4, window_bounds = array<i64: 1, 8>}, {pipeline_mode = #tpu.pipeline_mode<synchronous>, transform_indices = @transform_5, window_bounds = array<i64: 72, 8>}, {pipeline_mode = #tpu.pipeline_mode<synchronous>, transform_indices = @transform_6, window_bounds = array<i64: 1, 8>}, {pipeline_mode = #tpu.pipeline_mode<synchronous>, transform_indices = @transform_7, window_bounds = array<i64: 1, 8>}, {pipeline_mode = #tpu.pipeline_mode<synchronous>, transform_indices = @transform_8, window_bounds = array<i64: 8, 32>}, {pipeline_mode = #tpu.pipeline_mode<synchronous>, transform_indices = @transform_9, window_bounds = array<i64: 1, 32>}, {pipeline_mode = #tpu.pipeline_mode<synchronous>, transform_indices = @transform_10, window_bounds = array<i64: 1, 32>}, {pipeline_mode = #tpu.pipeline_mode<synchronous>, transform_indices = @transform_11, window_bounds = array<i64: 200, 32>}]} {
    %c0 = arith.constant 0 : index
    %c0_0 = arith.constant 0 : index
    %0 = vector.load %arg1[%c0, %c0_0] : memref<222x32xf32, #tpu.memory_space<vmem>>, vector<222x32xf32>
    %c0_1 = arith.constant 0 : index
    %c0_2 = arith.constant 0 : index
    %1 = vector.load %arg2[%c0_1, %c0_2] : memref<222x8xf32, #tpu.memory_space<vmem>>, vector<222x8xf32>
    %c0_3 = arith.constant 0 : index
    %c0_4 = arith.constant 0 : index
    %2 = vector.load %arg4[%c0_3, %c0_4] : memref<1x8xf32, #tpu.memory_space<vmem>>, vector<1x8xf32>
    %c0_5 = arith.constant 0 : index
    %c0_6 = arith.constant 0 : index
    %3 = vector.load %arg5[%c0_5, %c0_6] : memref<1x8xf32, #tpu.memory_space<vmem>>, vector<1x8xf32>
    %c0_7 = arith.constant 0 : index
    %c0_8 = arith.constant 0 : index
    %4 = vector.load %arg7[%c0_7, %c0_8] : memref<1x8xf32, #tpu.memory_space<vmem>>, vector<1x8xf32>
    %c0_9 = arith.constant 0 : index
    %c0_10 = arith.constant 0 : index
    %5 = vector.load %arg8[%c0_9, %c0_10] : memref<1x8xf32, #tpu.memory_space<vmem>>, vector<1x8xf32>
    %c0_11 = arith.constant 0 : index
    %c0_12 = arith.constant 0 : index
    %6 = vector.load %arg10[%c0_11, %c0_12] : memref<1x32xf32, #tpu.memory_space<vmem>>, vector<1x32xf32>
    %c0_13 = arith.constant 0 : index
    %c0_14 = arith.constant 0 : index
    %7 = vector.load %arg11[%c0_13, %c0_14] : memref<1x32xf32, #tpu.memory_space<vmem>>, vector<1x32xf32>
    %8 = arith.truncf %0 : vector<222x32xf32> to vector<222x32xbf16>
    %c0_15 = arith.constant 0 : index
    %c0_16 = arith.constant 0 : index
    %9 = vector.load %arg3[%c0_15, %c0_16] : memref<32x8xbf16, #tpu.memory_space<vmem>>, vector<32x8xbf16>
    %cst = arith.constant dense<0.000000e+00> : vector<222x8xf32>
    %10 = tpu.matmul %8, %9, %cst {dimension_numbers = #tpu.dot_dimension_numbers<[1], [0], [0], [1], [0, 0, 1, 1], [], []>} : vector<222x32xbf16>, vector<32x8xbf16>, vector<222x8xf32> -> vector<222x8xf32>
    %11 = vector.broadcast %2 : vector<1x8xf32> to vector<222x8xf32>
    %12 = arith.mulf %10, %11 : vector<222x8xf32>
    %13 = vector.broadcast %3 : vector<1x8xf32> to vector<222x8xf32>
    %14 = arith.addf %12, %13 : vector<222x8xf32>
    %cst_17 = arith.constant 0.000000e+00 : f32
    %15 = vector.broadcast %cst_17 : f32 to vector<222x8xf32>
    %16 = arith.maximumf %14, %15 : vector<222x8xf32>
    %17 = arith.mulf %16, %1 : vector<222x8xf32>
    %18 = vector.extract_strided_slice %17 {offsets = [0, 0], sizes = [200, 8], strides = [1, 1]} : vector<222x8xf32> to vector<200x8xf32>
    %19 = vector.extract_strided_slice %17 {offsets = [1, 0], sizes = [200, 8], strides = [1, 1]} : vector<222x8xf32> to vector<200x8xf32>
    %20 = vector.extract_strided_slice %17 {offsets = [2, 0], sizes = [200, 8], strides = [1, 1]} : vector<222x8xf32> to vector<200x8xf32>
    %21 = vector.extract_strided_slice %17 {offsets = [10, 0], sizes = [200, 8], strides = [1, 1]} : vector<222x8xf32> to vector<200x8xf32>
    %22 = vector.extract_strided_slice %17 {offsets = [11, 0], sizes = [200, 8], strides = [1, 1]} : vector<222x8xf32> to vector<200x8xf32>
    %23 = vector.extract_strided_slice %17 {offsets = [12, 0], sizes = [200, 8], strides = [1, 1]} : vector<222x8xf32> to vector<200x8xf32>
    %24 = vector.extract_strided_slice %17 {offsets = [20, 0], sizes = [200, 8], strides = [1, 1]} : vector<222x8xf32> to vector<200x8xf32>
    %25 = vector.extract_strided_slice %17 {offsets = [21, 0], sizes = [200, 8], strides = [1, 1]} : vector<222x8xf32> to vector<200x8xf32>
    %26 = vector.extract_strided_slice %17 {offsets = [22, 0], sizes = [200, 8], strides = [1, 1]} : vector<222x8xf32> to vector<200x8xf32>
    %27 = tpu.concatenate %18, %19, %20, %21, %22, %23, %24, %25, %26 in 1 : vector<200x8xf32>, vector<200x8xf32>, vector<200x8xf32>, vector<200x8xf32>, vector<200x8xf32>, vector<200x8xf32>, vector<200x8xf32>, vector<200x8xf32>, vector<200x8xf32> -> vector<200x72xf32>
    %28 = arith.truncf %27 : vector<200x72xf32> to vector<200x72xbf16>
    %c0_18 = arith.constant 0 : index
    %c0_19 = arith.constant 0 : index
    %29 = vector.load %arg6[%c0_18, %c0_19] : memref<72x8xbf16, #tpu.memory_space<vmem>>, vector<72x8xbf16>
    %cst_20 = arith.constant dense<0.000000e+00> : vector<200x8xf32>
    %30 = tpu.matmul %28, %29, %cst_20 {dimension_numbers = #tpu.dot_dimension_numbers<[1], [0], [0], [1], [0, 0, 1, 1], [], []>} : vector<200x72xbf16>, vector<72x8xbf16>, vector<200x8xf32> -> vector<200x8xf32>
    %31 = vector.broadcast %4 : vector<1x8xf32> to vector<200x8xf32>
    %32 = arith.mulf %30, %31 : vector<200x8xf32>
    %33 = vector.broadcast %5 : vector<1x8xf32> to vector<200x8xf32>
    %34 = arith.addf %32, %33 : vector<200x8xf32>
    %cst_21 = arith.constant 0.000000e+00 : f32
    %35 = vector.broadcast %cst_21 : f32 to vector<200x8xf32>
    %36 = arith.maximumf %34, %35 : vector<200x8xf32>
    %37 = arith.truncf %36 : vector<200x8xf32> to vector<200x8xbf16>
    %c0_22 = arith.constant 0 : index
    %c0_23 = arith.constant 0 : index
    %38 = vector.load %arg9[%c0_22, %c0_23] : memref<8x32xbf16, #tpu.memory_space<vmem>>, vector<8x32xbf16>
    %cst_24 = arith.constant dense<0.000000e+00> : vector<200x32xf32>
    %39 = tpu.matmul %37, %38, %cst_24 {dimension_numbers = #tpu.dot_dimension_numbers<[1], [0], [0], [1], [0, 0, 1, 1], [], []>} : vector<200x8xbf16>, vector<8x32xbf16>, vector<200x32xf32> -> vector<200x32xf32>
    %40 = vector.broadcast %6 : vector<1x32xf32> to vector<200x32xf32>
    %41 = arith.mulf %39, %40 : vector<200x32xf32>
    %42 = vector.broadcast %7 : vector<1x32xf32> to vector<200x32xf32>
    %43 = arith.addf %41, %42 : vector<200x32xf32>
    %44 = vector.extract_strided_slice %0 {offsets = [11, 0], sizes = [200, 32], strides = [1, 1]} : vector<222x32xf32> to vector<200x32xf32>
    %45 = arith.addf %43, %44 : vector<200x32xf32>
    %cst_25 = arith.constant 0.000000e+00 : f32
    %46 = vector.broadcast %cst_25 : f32 to vector<200x32xf32>
    %47 = arith.maximumf %45, %46 : vector<200x32xf32>
    %c0_26 = arith.constant 0 : index
    %c0_27 = arith.constant 0 : index
    %48 = vector.load %arg12[%c0_26, %c0_27] : memref<200x32xf32, #tpu.memory_space<vmem>>, vector<200x32xf32>
    tpu.vector_store %arg12[%c0_26, %c0_27], %47 {strides = array<i32>} : memref<200x32xf32, #tpu.memory_space<vmem>>, vector<200x32xf32>,
    return
  }
  func.func @transform_0(%arg0: i32) -> (i32, i32) {
    %c0_i32 = arith.constant 0 : i32
    %c0_i32_0 = arith.constant 0 : i32
    %c0_i32_1 = arith.constant 0 : i32
    return %c0_i32, %c0_i32_0 : i32, i32
  }
  func.func @transform_1(%arg0: i32) -> (i32, i32) {
    %c0_i32 = arith.constant 0 : i32
    %c0_i32_0 = arith.constant 0 : i32
    %c0_i32_1 = arith.constant 0 : i32
    return %c0_i32, %c0_i32_0 : i32, i32
  }
  func.func @transform_2(%arg0: i32) -> (i32, i32) {
    %c0_i32 = arith.constant 0 : i32
    %c0_i32_0 = arith.constant 0 : i32
    %c0_i32_1 = arith.constant 0 : i32
    return %c0_i32, %c0_i32_0 : i32, i32
  }
  func.func @transform_3(%arg0: i32) -> (i32, i32) {
    %c0_i32 = arith.constant 0 : i32
    %c0_i32_0 = arith.constant 0 : i32
    %c0_i32_1 = arith.constant 0 : i32
    return %c0_i32, %c0_i32_0 : i32, i32
  }
  func.func @transform_4(%arg0: i32) -> (i32, i32) {
    %c0_i32 = arith.constant 0 : i32
    %c0_i32_0 = arith.constant 0 : i32
    %c0_i32_1 = arith.constant 0 : i32
    return %c0_i32, %c0_i32_0 : i32, i32
  }
  func.func @transform_5(%arg0: i32) -> (i32, i32) {
    %c0_i32 = arith.constant 0 : i32
    %c0_i32_0 = arith.constant 0 : i32
    %c0_i32_1 = arith.constant 0 : i32
    return %c0_i32, %c0_i32_0 : i32, i32
  }
  func.func @transform_6(%arg0: i32) -> (i32, i32) {
    %c0_i32 = arith.constant 0 : i32
    %c0_i32_0 = arith.constant 0 : i32
    %c0_i32_1 = arith.constant 0 : i32
    return %c0_i32, %c0_i32_0 : i32, i32
  }
  func.func @transform_7(%arg0: i32) -> (i32, i32) {
    %c0_i32 = arith.constant 0 : i32
    %c0_i32_0 = arith.constant 0 : i32
    %c0_i32_1 = arith.constant 0 : i32
    return %c0_i32, %c0_i32_0 : i32, i32
  }
  func.func @transform_8(%arg0: i32) -> (i32, i32) {
    %c0_i32 = arith.constant 0 : i32
    %c0_i32_0 = arith.constant 0 : i32
    %c0_i32_1 = arith.constant 0 : i32
    return %c0_i32, %c0_i32_0 : i32, i32
  }
  func.func @transform_9(%arg0: i32) -> (i32, i32) {
    %c0_i32 = arith.constant 0 : i32
    %c0_i32_0 = arith.constant 0 : i32
    %c0_i32_1 = arith.constant 0 : i32
    return %c0_i32, %c0_i32_0 : i32, i32
  }
  func.func @transform_10(%arg0: i32) -> (i32, i32) {
    %c0_i32 = arith.constant 0 : i32
    %c0_i32_0 = arith.constant 0 : i32
    %c0_i32_1 = arith.constant 0 : i32
    return %c0_i32, %c0_i32_0 : i32, i32
  }
  func.func @transform_11(%arg0: i32) -> (i32, i32) {
    %c0_i32 = arith.constant 0 : i32
    %c0_i32_0 = arith.constant 0 : i32
    %c0_i32_1 = arith.constant 0 : i32
    return %c0_i32, %c0_i32_0 : i32, i32
  }
}

</mosaic_0001>

<bundles_post_ra>
// kernel: tpu_custom_call.1
= control target key start
LH: loop header
LB: loop body
LE: loop exit
PB: predicated region body
PF: predicated region fallthrough
CT: control target
= control target key end

     0   :  { %vm131_vm0 = vcmask 261120   ;;  %vm596_vm1 = vcmask 1045504   ;;  %vm469_vm2 = vcmask 1046528   ;;  %vm801_vm3 = vcmask 1044480   ;;  %s3120_s13 = smov 24   ;;  %s3121_s14 = smov 8   ;;  %s5265_s2 = inlined_call_operand.vmem [shape: bf16[32,8], index: 2, kind: input, shape index: {}]   ;;  %s5266_s0 = inlined_call_operand.vmem [shape: f32[222,32], index: 0, kind: input, shape index: {}]   ;;  %s5267_s3 = inlined_call_operand.vmem [shape: f32[1,8], index: 3, kind: input, shape index: {}]   ;;  %s5268_s4 = inlined_call_operand.vmem [shape: f32[1,8], index: 4, kind: input, shape index: {}]   ;;  %s5269_s1 = inlined_call_operand.vmem [shape: f32[222,8], index: 1, kind: input, shape index: {}]   ;;  %s5270_s5 = inlined_call_operand.vmem [shape: bf16[72,8], index: 5, kind: input, shape index: {}]   ;;  %s5271_s8 = inlined_call_operand.vmem [shape: bf16[8,32], index: 8, kind: input, shape index: {}]   ;;  %s5272_s6 = inlined_call_operand.vmem [shape: f32[1,8], index: 6, kind: input, shape index: {}]   ;;  %s5273_s7 = inlined_call_operand.vmem [shape: f32[1,8], index: 7, kind: input, shape index: {}]   ;;  %s5274_s9 = inlined_call_operand.vmem [shape: f32[1,32], index: 9, kind: input, shape index: {}]   ;;  %s5275_s10 = inlined_call_operand.vmem [shape: f32[1,32], index: 10, kind: input, shape index: {}]   ;;  %s5276_s11 = inlined_call_operand.vmem [shape: f32[200,32], index: 11, kind: output, shape index: {}]  }
   0x1   :  { %v3087_v0 = vld [vmem:[%s5265_s2] sm:$0xff]   ;;  %v3088_v1 = vld [vmem:[%s5265_s2 + $0x8] sm:$0xff]   ;;  %v41_v7 = vld [vmem:[%s5266_s0 + $0x10] sm:$0xff]  ;;  %vm928_vm4 = vcmask 1043456   ;;  %s3122_s15 = smov 32   ;;  %vm1260_vm5 = vcmask 1041408  }
   0x2   :  { %2445 = vmatprep.subr.bf16.mxu0 %v3087_v0  ;;  %2593 = vmatprep.subr.bf16.mxu1 %v3087_v0  ;;  %v39_v2 = vld [vmem:[%s5266_s0] sm:$0xff]  ;;  %v40_v3 = vld [vmem:[%s5266_s0 + $0x8] sm:$0xff]  ;;  %v42_v8 = vld [vmem:[%s5266_s0 + $0x18] sm:$0xff]  ;;  %vm1133_vm6 = vcmask 1042432   ;;  %s3123_s16 = smov 16   ;;  %s3124_s19 = smov 48  }
   0x3   :  { %v55_v4 = vld [vmem:[%s5266_s0 + $0x80] sm:$0xff]  ;;  %2446 = vmatpush3.bf16.msra.mxu0 %v3087_v0  ;;  %2595 = vmatpush3.bf16.msra.mxu1 %v3087_v0  ;;  %v101_v5 = vpack.c.bf16 %v40_v3, %v39_v2  ;;  %v56_v6 = vld [vmem:[%s5266_s0 + $0x88] sm:$0xff]  ;;  %v57_v10 = vld [vmem:[%s5266_s0 + $0x90] sm:$0xff]  ;;  %v102_v16 = vpack.c.bf16 %v42_v8, %v41_v7  ;;  %s3126_s21 = smov 64   ;;  %s3127_s22 = smov 56   ;;  %vm3129_vm7 = vmmov 0  }
   0x4   :  { %2447 = vmatprep.subr.bf16.mxu0 %v3088_v1  ;;  %2594 = vmatprep.subr.bf16.mxu1 %v3088_v1  ;;  %v109_v9 = vpack.c.bf16 %v56_v6, %v55_v4  ;;  %v58_v11 = vld [vmem:[%s5266_s0 + $0x98] sm:$0xff]  ;;  %v43_v12 = vld [vmem:[%s5266_s0 + $0x20] sm:$0xff]  ;;  %v44_v13 = vld [vmem:[%s5266_s0 + $0x28] sm:$0xff]  ;;  %vm1387_vm8 = vcmask 64512   ;;  %vm1413_vm9 = vcmask 130048   ;;  %vm1439_vm10 = vcmask 195584  }
   0x5   :  { %2449 = vmatprep.mubr.msk.bf16.mxu0 %vm131_vm0, %v101_v5  ;;  %v59_v14 = vld [vmem:[%s5266_s0 + $0xa0] sm:$0xff]  ;;  %v60_v15 = vld [vmem:[%s5266_s0 + $0xa8] sm:$0xff]  ;;  %v110_v17 = vpack.c.bf16 %v58_v11, %v57_v10  ;;  %v103_v18 = vpack.c.bf16 %v44_v13, %v43_v12  ;;  %v45_v20 = vld [vmem:[%s5266_s0 + $0x30] sm:$0xff]  ;;  %vm1490_vm11 = vcmask 326656   ;;  %vm1516_vm12 = vcmask 392192  }
   0x6   :  { %2465 = vmatprep.mubr.msk.bf16.mxu1 %vm131_vm0, %v109_v9  ;;  %v111_v19 = vpack.c.bf16 %v60_v15, %v59_v14  ;;  %v46_v21 = vld [vmem:[%s5266_s0 + $0x38] sm:$0xff]  ;;  %v61_v22 = vld [vmem:[%s5266_s0 + $0xb0] sm:$0xff]  ;;  %v47_v24 = vld [vmem:[%s5266_s0 + $0x40] sm:$0xff]  ;;  %vm1542_vm13 = vcmask 457728   ;;  %vm1568_vm14 = vcmask 523264   ;;  %vm1643_vm15 = vcmask 588800  }
   0x7   :  { %2448 = vmatpush3.bf16.msra.mxu0 %v3088_v1  ;;  %2596 = vmatpush3.bf16.msra.mxu1 %v3088_v1  ;;  %v62_v23 = vld [vmem:[%s5266_s0 + $0xb8] sm:$0xff]  ;;  %v48_v25 = vld [vmem:[%s5266_s0 + $0x48] sm:$0xff]  ;;  %v63_v26 = vld [vmem:[%s5266_s0 + $0xc0] sm:$0xff]  ;;  %v104_v28 = vpack.c.bf16 %v46_v21, %v45_v20 }
   0x8   :  { %v64_v27 = vld [vmem:[%s5266_s0 + $0xc8] sm:$0xff]  ;;  %v112_v29 = vpack.c.bf16 %v62_v23, %v61_v22  ;;  %v105_v30 = vpack.c.bf16 %v48_v25, %v47_v24  ;;  %v49_v32 = vld [vmem:[%s5266_s0 + $0x50] sm:$0xff]  ;;  %v50_v33 = vld [vmem:[%s5266_s0 + $0x58] sm:$0xff] }
   0x9   :  { %v113_v31 = vpack.c.bf16 %v64_v27, %v63_v26  ;;  %v65_v34 = vld [vmem:[%s5266_s0 + $0xd0] sm:$0xff]  ;;  %v66_v35 = vld [vmem:[%s5266_s0 + $0xd8] sm:$0x3f]  ;;  %v51_v36 = vld [vmem:[%s5266_s0 + $0x60] sm:$0xff]  ;;  %v106_v38 = vpack.c.bf16 %v50_v33, %v49_v32 }
   0xa   :  { %2450 = vmatmul.mubr.msk.bf16.vlgmr.msra.gmra.mrb[0].mxu0 %vm131_vm0, %v102_v16  ;;  %2466 = vmatmul.mubr.msk.bf16.vlgmr.msra.gmra.mrb[0].mxu1 %vm131_vm0, %v110_v17  ;;  %v52_v37 = vld [vmem:[%s5266_s0 + $0x68] sm:$0xff]  ;;  %v114_v39 = vpack.c.bf16 %v66_v35, %v65_v34  ;;  %v53_v41 = vld [vmem:[%s5266_s0 + $0x70] sm:$0xff]  ;;  %v54_v42 = vld [vmem:[%s5266_s0 + $0x78] sm:$0xff] }
   0xb   :  { %2453 = vmatprep.mubr.msk.bf16.mxu0 %vm131_vm0, %v103_v18  ;;  %2469 = vmatprep.mubr.msk.bf16.mxu1 %vm131_vm0, %v111_v19  ;;  %v107_v40 = vpack.c.bf16 %v52_v37, %v51_v36  ;;  %v108_v43 = vpack.c.bf16 %v54_v42, %v53_v41  ;;  %v3297_v44 = vld [vmem:[%s5267_s3] ss:$0 sm:$0xff]  ;;  %v68_v9 = vld [vmem:[%s5269_s1 + $0x8] sm:$0xff]  ;;  %v69_v14 = vld [vmem:[%s5269_s1 + $0x10] sm:$0xff] }
   0xc   :  { %v3303_v52 = vld [vmem:[%s5268_s4] ss:$0 sm:$0xff]  ;;  %v70_v16 = vld [vmem:[%s5269_s1 + $0x18] sm:$0xff]  ;;  %v85_v35 = vld [vmem:[%s5269_s1 + $0x90] sm:$0xff]  ;;  %s3125_s4 = smov 40  }
   0xd   :  { %v67_v22 = vld [vmem:[%s5269_s1] sm:$0xff] }
   0xe   :  { %v83_v36 = vld [vmem:[%s5269_s1 + $0x80] sm:$0xff] }
  0x12   :  { %2454 = vmatmul.mubr.msk.bf16.gmra.mrb[4].mxu0 %vm131_vm0, %v104_v28  ;;  %2470 = vmatmul.mubr.msk.bf16.gmra.mrb[4].mxu1 %vm131_vm0, %v112_v29 }
  0x13   :  { %2457 = vmatprep.mubr.msk.bf16.mxu0 %vm131_vm0, %v105_v30  ;;  %2473 = vmatprep.mubr.msk.bf16.mxu1 %vm131_vm0, %v113_v31 }
  0x1a   :  { %2458 = vmatmul.mubr.msk.bf16.gmra.mrb[8].mxu0 %vm131_vm0, %v106_v38  ;;  %2474 = vmatmul.mubr.msk.bf16.gmra.mrb[8].mxu1 %vm131_vm0, %v114_v39 }
  0x1b   :  { %2461 = vmatprep.mubr.msk.bf16.mxu0 %vm131_vm0, %v107_v40 }
  0x22   :  { %2462 = vmatmul.mubr.msk.bf16.gmra.mrb[12].mxu0 %vm131_vm0, %v108_v43 }
  0xdd   :  { %v2451_v45 = vpop.f32.mrb[0].mxu0  ;;  %v2467_v46 = vpop.f32.mrb[0].mxu1 }
  0xde   :  { %v208_v47 = vpop.f32.mrb[1].mxu0  ;;  %v272_v48 = vpop.f32.mrb[1].mxu1  ;;  %v327_v49 = vmul.f32 %v2451_v45, %v3297_v44  ;;  %v343_v58 = vmul.f32 %v2467_v46, %v3297_v44  ;;  %v84_v46 = vld [vmem:[%s5269_s1 + $0x88] sm:$0xff] }
  0xdf   :  { %v2452_v50 = vpop.f32.mrb[2].mxu0  ;;  %v2468_v51 = vpop.f32.mrb[2].mxu1  ;;  %v325_v53 = vmul.f32 %v3297_v44, %v208_v47  ;;  %v341_v62 = vmul.f32 %v3297_v44, %v272_v48 }
  0xe0   :  { %v328_v54 = vmul.f32 %v2452_v50, %v3297_v44  ;;  %v211_v55 = vpop.f32.mrb[3].mxu0  ;;  %v275_v56 = vpop.f32.mrb[3].mxu1  ;;  %v361_v59 = vadd.f32 %v3303_v52, %v327_v49  ;;  %v377_v10 = vadd.f32 %v3303_v52, %v343_v58  ;;  %v344_v30 = vmul.f32 %v2468_v51, %v3297_v44 }
  0xe1   :  { %v326_v57 = vmul.f32 %v3297_v44, %v211_v55  ;;  %v359_v63 = vadd.f32 %v3303_v52, %v325_v53  ;;  %v342_v3 = vmul.f32 %v3297_v44, %v275_v56  ;;  %v375_v11 = vadd.f32 %v3303_v52, %v341_v62 }
  0xe2   :  { %v362_v60 = vadd.f32 %v3303_v52, %v328_v54  ;;  %v389_v7 = vmax.f32 %v361_v59, 0.0  ;;  %v405_v33 = vmax.f32 %v377_v10, 0.0  ;;  %v3374_v45 = vadd.f32 %v3303_v52, %v344_v30 }
  0xe3   :  { %v360_v61 = vadd.f32 %v3303_v52, %v326_v57  ;;  %v387_v15 = vmax.f32 %v359_v63, 0.0  ;;  %v376_v25 = vadd.f32 %v3303_v52, %v342_v3  ;;  %v403_v34 = vmax.f32 %v375_v11, 0.0 }
  0xe4   :  { %v390_v8 = vmax.f32 %v362_v60, 0.0  ;;  %v3351_v28 = vmul.f32 %v389_v7, %v69_v14  ;;  %v3383_v51 = vmul.f32 %v405_v33, %v85_v35 }
  0xe5   :  { %v3314_v0 = vpop.f32.mrb[4].mxu0  ;;  %v2471_v1 = vpop.f32.mrb[4].mxu1  ;;  %v388_v2 = vmax.f32 %v360_v61, 0.0  ;;  %v3359_v32 = vmul.f32 %v387_v15, %v67_v22  ;;  %v404_v39 = vmax.f32 %v376_v25, 0.0  ;;  %v3385_v53 = vmul.f32 %v403_v34, %v83_v36 }
  0xe6   :  { %v347_v4 = vmul.f32 %v2471_v1, %v3297_v44  ;;  %v224_v5 = vpop.f32.mrb[5].mxu0  ;;  %v3318_v6 = vpop.f32.mrb[5].mxu1  ;;  %v3353_v29 = vmul.f32 %v390_v8, %v70_v16  ;;  %v600_v47 = vrot.slane %v3351_v28, 2  ;;  %v473_v60 = vrot.slane %v3351_v28, 1 }
  0xe7   :  { %v2456_v12 = vpop.f32.mrb[6].mxu0  ;;  %v2472_v13 = vpop.f32.mrb[6].mxu1  ;;  %v3342_v24 = vmul.f32 %v388_v2, %v68_v9  ;;  %v329_v40 = vmul.f32 %v3297_v44, %v224_v5  ;;  %v470_v54 = vrot.slane %v3359_v32, 1  ;;  %v3399_v62 = vmul.f32 %v404_v39, %v84_v46 }
  0xe8   :  { %v3332_v17 = vadd.f32 %v3303_v52, %v347_v4  ;;  %v332_v18 = vmul.f32 %v2456_v12, %v3297_v44  ;;  %v348_v19 = vmul.f32 %v2472_v13, %v3297_v44  ;;  %v3336_v20 = vpop.f32.mrb[7].mxu0  ;;  %v291_v21 = vpop.f32.mrb[7].mxu1  ;;  %v602_v48 = vrot.slane %v3353_v29, 2 }
  0xe9   :  { %v346_v23 = vmul.f32 %v3297_v44, %v291_v21  ;;  %v598_v41 = vrot.slane %v3342_v24, 2  ;;  %v471_v55 = vrot.slane %v3342_v24, 1  ;;  %v3402_v63 = vadd.f32 %v3303_v52, %v329_v40 }
  0xea   :  { %v3346_v26 = vadd.f32 %v3303_v52, %v332_v18  ;;  %v3349_v27 = vadd.f32 %v3303_v52, %v348_v19  ;;  %v3395_v59 = vsel %vm596_vm1, %v600_v47, %v602_v48  ;;  %v597_v3 = vrot.slane %v3359_v32, 2 }
  0xeb   :  { %v3357_v31 = vadd.f32 %v3303_v52, %v346_v23  ;;  %v601_v58 = vsel %vm596_vm1, %v598_v41, %v600_v47  ;;  %v472_v2 = vsel %vm469_vm2, %v470_v54, %v471_v55  ;;  %v474_v4 = vsel %vm469_vm2, %v471_v55, %v473_v60 }
  0xec   :  { %v2617_v1 = vpack.i.bf16 %v3395_v59, %v601_v58  ;;  %v802_v7 = vrot.slane %v3342_v24, 3  ;;  %v2607_v8 = vpack.i.bf16 %v474_v4, %v472_v2  ;;  %v803_v9 = vrot.slane %v3351_v28, 3 }
  0xed   :  { %v2459_v37 = vpop.f32.mrb[8].mxu0  ;;  %v3367_v38 = vpop.f32.mrb[8].mxu1  ;;  %v805_v10 = vrot.slane %v3353_v29, 3  ;;  %v599_v12 = vsel %vm596_vm1, %v597_v3, %v598_v41  ;;  %v5281_v16 = vrot.slane %v3385_v53, 4  ;;  %v962_v39 = vrot.slane %v3383_v51, 4 }
  0xee   :  { %v240_v42 = vpop.f32.mrb[9].mxu0  ;;  %v3371_v43 = vpop.f32.mrb[9].mxu1  ;;  %v335_v61 = vmul.f32 %v2459_v37, %v3297_v44  ;;  %2618 = vrot.lane.b32.xlu1 %v2617_v1, %s3120_s13  ;;  %2608 = vrot.lane.b32.xlu0 %v2607_v8, %s3121_s14  ;;  %v804_v18 = vsel %vm801_vm3, %v802_v7, %v803_v9  ;;  %v2612_v35 = vpack.i.bf16 %v601_v58, %v599_v12  ;;  %v960_v37 = vrot.slane %v3399_v62, 4  ;;  %v71_v12 = vld [vmem:[%s5269_s1 + $0x20] sm:$0xff] }
  0xef   :  { %v2460_v49 = vpop.f32.mrb[10].mxu0  ;;  %v3381_v50 = vpop.f32.mrb[10].mxu1  ;;  %v333_v11 = vmul.f32 %v3297_v44, %v240_v42  ;;  %v806_v19 = vsel %vm801_vm3, %v803_v9, %v805_v10  ;;  %v406_v41 = vmax.f32 %v3374_v45, 0.0  ;;  %v929_v42 = vrot.slane %v3342_v24, 4 }
  0xf0   :  { %v243_v56 = vpop.f32.mrb[11].mxu0  ;;  %v3389_v57 = vpop.f32.mrb[11].mxu1  ;;  %v3411_v5 = vadd.f32 %v3303_v52, %v335_v61  ;;  %v336_v13 = vmul.f32 %v2460_v49, %v3297_v44  ;;  %v2622_v25 = vpack.i.bf16 %v806_v19, %v804_v18  ;;  %v391_v46 = vmax.f32 %v3402_v63, 0.0 }
  0xf1   :  { %v334_v14 = vmul.f32 %v3297_v44, %v243_v56  ;;  %v3428_v21 = vadd.f32 %v3303_v52, %v333_v11  ;;  %v3452_v47 = vsel %vm928_vm4, %v5281_v16, %v960_v37  ;;  %v3457_v45 = vsel %vm928_vm4, %v960_v37, %v962_v39  ;;  %v86_v56 = vld [vmem:[%s5269_s1 + $0x98] sm:$0xff] }
  0xf2   :  { %v3432_v30 = vadd.f32 %v3303_v52, %v336_v13  ;;  %2623 = vrot.lane.b32.xlu1 %v2622_v25, %s3122_s15  ;;  %2613 = vrot.lane.b32.xlu0 %v2612_v35, %s3123_s16  ;;  %v930_v49 = vrot.slane %v3351_v28, 4  ;;  %v345_v54 = vmul.f32 %v3297_v44, %v3318_v6  ;;  %v2632_v55 = vpack.i.bf16 %v3457_v45, %v3452_v47 }
  0xf3   :  { %v3435_v33 = vadd.f32 %v3303_v52, %v334_v14  ;;  %v932_v61 = vrot.slane %v3353_v29, 4  ;;  %v5279_v6 = vrot.slane %v3385_v53, 6  ;;  %v1290_v2 = vrot.slane %v3399_v62, 6 }
  0xf4   :  { %v931_v58 = vsel %vm928_vm4, %v929_v42, %v930_v49  ;;  %v1292_v3 = vrot.slane %v3383_v51, 6  ;;  %v5280_v4 = vrot.slane %v3385_v53, 5  ;;  %v1163_v11 = vrot.slane %v3399_v62, 5 }
  0xf5   :  { %v2463_v15 = vpop.f32.mrb[12].mxu0  ;;  %v3479_v7 = vsel %vm928_vm4, %v930_v49, %v932_v61  ;;  %v1291_v14 = vsel %vm1260_vm5, %v5279_v6, %v1290_v2  ;;  %v1165_v18 = vrot.slane %v3383_v51, 5  ;;  %v3499_v19 = vmul.f32 %v406_v41, %v86_v56 }
  0xf6   :  { %v339_v22 = vmul.f32 %v2463_v15, %v3297_v44  ;;  %v256_v23 = vpop.f32.mrb[13].mxu0  ;;  %2633 = vrot.lane.b32.xlu1 %v2632_v55, %s3124_s19  ;;  %v2627_v13 = vpack.i.bf16 %v3479_v7, %v931_v58  ;;  %v1293_v15 = vsel %vm1260_vm5, %v1290_v2, %v1292_v3  ;;  %v630_v35 = vrot.slane %v3399_v62, 2 }
  0xf7   :  { %v2464_v34 = vpop.f32.mrb[14].mxu0  ;;  %v337_v63 = vmul.f32 %v3297_v44, %v256_v23  ;;  %v1164_v23 = vsel %vm1133_vm6, %v5280_v4, %v1163_v11  ;;  %v1166_v25 = vsel %vm1133_vm6, %v1163_v11, %v1165_v18  ;;  %v632_v37 = vrot.slane %v3383_v51, 2 }
  0xf8   :  { %v3438_v36 = vadd.f32 %v3303_v52, %v339_v22  ;;  %v3442_v40 = vpop.f32.mrb[15].mxu0  ;;  %v340_v1 = vmul.f32 %v2464_v34, %v3297_v44  ;;  %v2642_v22 = vpack.i.bf16 %v1293_v15, %v1291_v14  ;;  %2628 = vrot.lane.b32.xlu0 %v2627_v13, %s3125_s4  ;;  %v5282_v34 = vrot.slane %v3385_v53, 2 }
  0xf9   :  { %v3482_v8 = vadd.f32 %v3303_v52, %v337_v63  ;;  %v3511_v41 = vmul.f32 %v391_v46, %v71_v12  ;;  %v379_v42 = vadd.f32 %v3303_v52, %v345_v54  ;;  %v2637_v49 = vpack.i.bf16 %v1166_v25, %v1164_v23 }
  0xfa   :  { %v3485_v9 = vadd.f32 %v3303_v52, %v340_v1  ;;  %2643 = vrot.lane.b32.xlu1 %v2642_v22, %s3126_s21  ;;  %v5278_v55 = vrot.slane %v3385_v53, 1  ;;  %v3519_v56 = vsel %vm596_vm1, %v5282_v34, %v630_v35  ;;  %v633_v58 = vsel %vm596_vm1, %v630_v35, %v632_v37  ;;  %v72_v34 = vld [vmem:[%s5269_s1 + $0x28] sm:$0xff] }
  0xfb   :  { %v503_v63 = vrot.slane %v3399_v62, 1  ;;  %v505_v46 = vrot.slane %v3383_v51, 1  ;;  %v2652_v1 = vpack.i.bf16 %v633_v58, %v3519_v56  ;;  %v351_v54 = vmul.f32 %v3367_v38, %v3297_v44 }
  0xfc   :  { %v349_v2 = vmul.f32 %v3297_v44, %v3371_v43  ;;  %v352_v11 = vmul.f32 %v3381_v50, %v3297_v44  ;;  %2638 = vrot.lane.b32.xlu0 %v2637_v49, %s3127_s22  ;;  %v5277_v14 = vrot.slane %v3399_v62, 3  ;;  %v835_v38 = vrot.slane %v3383_v51, 3 }
  0xfd   :  { %v504_v12 = vsel %vm469_vm2, %v5278_v55, %v503_v63  ;;  %v506_v13 = vsel %vm469_vm2, %v503_v63, %v505_v46  ;;  %v3542_v50 = vadd.f32 %v3303_v52, %v351_v54  ;;  %v5283_v25 = vrot.slane %v3499_v19, 3 }
  0xfe   :  { %2653 = vrot.lane.b32.xlu1 %v2652_v1, %s3123_s16  ;;  %v2647_v43 = vpack.i.bf16 %v506_v13, %v504_v12  ;;  %v3545_v15 = vadd.f32 %v3303_v52, %v349_v2  ;;  %v3548_v22 = vadd.f32 %v3303_v52, %v352_v11  ;;  %v836_v23 = vsel %vm801_vm3, %v5277_v14, %v835_v38 }
  0xff   :  { %v634_v35 = vrot.slane %v3499_v19, 2  ;;  %v350_v49 = vmul.f32 %v3297_v44, %v3389_v57  ;;  %v964_v63 = vrot.slane %v3499_v19, 4  ;;  %v838_v1 = vsel %vm801_vm3, %v835_v38, %v5283_v25 }
 0x100   :  { %2648 = vrot.lane.b32.xlu0 %v2647_v43, %s3121_s14  ;;  %v934_v11 = vrot.slane %v3511_v41, 4  ;;  %v330_v57 = vmul.f32 %v3297_v44, %v3336_v20  ;;  %v2662_v12 = vpack.i.bf16 %v838_v1, %v836_v23  ;;  %v407_v13 = vmax.f32 %v379_v42, 0.0 }
 0x101   :  { %v3565_v54 = vsel %vm596_vm1, %v632_v37, %v634_v35  ;;  %v3568_v2 = vadd.f32 %v3303_v52, %v350_v49  ;;  %v87_v37 = vld [vmem:[%s5269_s1 + $0xa0] sm:$0xff]  ;;  %v965_v20 = vsel %vm928_vm4, %v962_v39, %v964_v63  ;;  %v1137_v42 = vrot.slane %v3511_v41, 5 }
 0x102   :  { %v2657_v43 = vpack.i.bf16 %v3565_v54, %v633_v58  ;;  %v3579_v38 = vsel %vm928_vm4, %v932_v61, %v934_v11  ;;  %2663 = vrot.lane.b32.xlu1 %v2662_v12, %s3122_s15  ;;  %v1262_v58 = vrot.slane %v3353_v29, 6  ;;  %v364_v23 = vadd.f32 %v3303_v52, %v330_v57 }
 0x103   :  { %v2672_v61 = vpack.i.bf16 %v3579_v38, %v3479_v7  ;;  %v1135_v49 = vrot.slane %v3353_v29, 5  ;;  %v5284_v1 = vrot.slane %v3511_v41, 6  ;;  %v3596_v12 = vmul.f32 %v407_v13, %v87_v37 }
 0x104   :  { %2658 = vrot.lane.b32.xlu0 %v2657_v43, %s3120_s13  ;;  %v604_v14 = vrot.slane %v3511_v41, 2  ;;  %v2667_v39 = vpack.i.bf16 %v965_v20, %v3457_v45  ;;  %v1261_v43 = vrot.slane %v3351_v28, 6  ;;  %v1134_v55 = vrot.slane %v3351_v28, 5 }
 0x105   :  { %v1138_v7 = vsel %vm1133_vm6, %v1135_v49, %v1137_v42  ;;  %v1265_v57 = vsel %vm1260_vm5, %v1262_v58, %v5284_v1  ;;  %v477_v13 = vrot.slane %v3511_v41, 1  ;;  %v331_v37 = vmul.f32 %v3314_v0, %v3297_v44 }
 0x106   :  { %2673 = vrot.lane.b32.xlu1 %v2672_v61, %s3124_s19  ;;  %v1263_v45 = vsel %vm1260_vm5, %v1261_v43, %v1262_v58  ;;  %v392_v61 = vmax.f32 %v364_v23, 0.0  ;;  %v1136_v6 = vsel %vm1133_vm6, %v1134_v55, %v1135_v49  ;;  %v475_v16 = vrot.slane %v3353_v29, 1 }
 0x107   :  { %v2682_v4 = vpack.i.bf16 %v1265_v57, %v1263_v45  ;;  %v605_v25 = vsel %vm596_vm1, %v602_v48, %v604_v14  ;;  %v2677_v1 = vpack.i.bf16 %v1138_v7, %v1136_v6  ;;  %v966_v0 = vrot.slane %v3596_v12, 4 }
 0x108   :  { %2668 = vrot.lane.b32.xlu0 %v2667_v39, %s3125_s4  ;;  %v478_v55 = vsel %vm469_vm2, %v475_v16, %v477_v13  ;;  %v1167_v58 = vrot.slane %v3499_v19, 5  ;;  %v5287_v23 = vrot.slane %v3596_v12, 5  ;;  %v365_v49 = vadd.f32 %v3303_v52, %v331_v37  ;;  %v73_v37 = vld [vmem:[%s5269_s1 + $0x30] sm:$0xff] }
 0x109   :  { %v3631_v39 = vmul.f32 %v392_v61, %v72_v34  ;;  %v2692_v48 = vpack.i.bf16 %v605_v25, %v3395_v59  ;;  %v476_v6 = vsel %vm469_vm2, %v473_v60, %v475_v16  ;;  %v3640_v43 = vsel %vm928_vm4, %v964_v63, %v966_v0 }
 0x10a   :  { %2683 = vrot.lane.b32.xlu1 %v2682_v4, %s3126_s21  ;;  %v2687_v4 = vpack.i.bf16 %v478_v55, %v476_v6  ;;  %v1294_v7 = vrot.slane %v3499_v19, 6  ;;  %v1168_v59 = vsel %vm1133_vm6, %v1165_v18, %v1167_v58  ;;  %v1170_v60 = vsel %vm1133_vm6, %v1167_v58, %v5287_v23 }
 0x10b   :  { %v507_v16 = vrot.slane %v3499_v19, 1  ;;  %v5286_v34 = vrot.slane %v3596_v12, 1  ;;  %v393_v63 = vmax.f32 %v365_v49, 0.0  ;;  %v2697_v57 = vpack.i.bf16 %v3640_v43, %v965_v20 }
 0x10c   :  { %2678 = vrot.lane.b32.xlu0 %v2677_v1, %s3127_s22  ;;  %v5288_v1 = vrot.slane %v3596_v12, 6  ;;  %v2702_v45 = vpack.i.bf16 %v1170_v60, %v1168_v59  ;;  %v1295_v18 = vsel %vm1260_vm5, %v1292_v3, %v1294_v7  ;;  %v636_v55 = vrot.slane %v3596_v12, 2 }
 0x10d   :  { %v508_v20 = vsel %vm469_vm2, %v505_v46, %v507_v16  ;;  %v510_v58 = vsel %vm469_vm2, %v507_v16, %v5286_v34  ;;  %v606_v49 = vrot.slane %v3631_v39, 2  ;;  %v338_v3 = vmul.f32 %v3297_v44, %v3442_v40  ;;  %v3091_v34 = vld [vmem:[%s5270_s5 + $0x10] sm:$0xff]  }
 0x10e   :  { %2693 = vrot.lane.b32.xlu1 %v2692_v48, %s3123_s16  ;;  %v1297_v61 = vsel %vm1260_vm5, %v1294_v7, %v5288_v1  ;;  %v3676_v48 = vmul.f32 %v393_v63, %v73_v37  ;;  %v3683_v46 = vsel %vm596_vm1, %v634_v35, %v636_v55  ;;  %v809_v7 = vrot.slane %v3631_v39, 3 }
 0x10f   :  { %v2707_v6 = vpack.i.bf16 %v1297_v61, %v1295_v18  ;;  %v3687_v59 = vadd.f32 %v3303_v52, %v338_v3  ;;  %v607_v44 = vsel %vm596_vm1, %v604_v14, %v606_v49  ;;  %v936_v40 = vrot.slane %v3631_v39, 4  ;;  %v74_v52 = vld [vmem:[%s5269_s1 + $0x38] sm:$0xff] }
 0x110   :  { %2688 = vrot.lane.b32.xlu0 %v2687_v4, %s3121_s14  ;;  %5318 = vst [vmem:[#allocation2_spill] sm:$0xff] %v3676_v48  ;;  %v2712_v4 = vpack.i.bf16 %v510_v58, %v508_v20  ;;  %v807_v60 = vrot.slane %v3511_v41, 3  ;;  %v394_v16 = vmax.f32 %v3346_v26, 0.0  ;;  %v2717_v35 = vpack.i.bf16 %v3683_v46, %v3565_v54 }
 0x111   :  { %v2722_v63 = vpack.i.bf16 %v607_v44, %v605_v25  ;;  %v938_v14 = vrot.slane %v3676_v48, 4  ;;  %v937_v37 = vsel %vm928_vm4, %v934_v11, %v936_v40  ;;  %v1139_v26 = vrot.slane %v3631_v39, 5 }
 0x112   :  { %2698 = vrot.lane.b32.xlu1 %v2697_v57, %s3124_s19  ;;  %v810_v57 = vsel %vm801_vm3, %v807_v60, %v809_v7  ;;  %v808_v25 = vsel %vm801_vm3, %v805_v10, %v807_v60  ;;  %v3712_v54 = vmul.f32 %v394_v16, %v74_v52  ;;  %v2732_v61 = vpack.i.bf16 %v937_v37, %v3579_v38  ;;  %v88_v60 = vld [vmem:[%s5269_s1 + $0xa8] sm:$0xff] }
 0x113   :  { %v2727_v18 = vpack.i.bf16 %v810_v57, %v808_v25  ;;  %v939_v20 = vsel %vm928_vm4, %v936_v40, %v938_v14  ;;  %v1266_v58 = vrot.slane %v3631_v39, 6  ;;  %v1268_v11 = vrot.slane %v3676_v48, 6 }
 0x114   :  { %2703 = vrot.lane.b32.xlu0 %v2702_v45, %s3127_s22  ;;  %v1141_v45 = vrot.slane %v3676_v48, 5  ;;  %5319 = vst [vmem:[#allocation3_spill] sm:$0xff] %v3712_v54  ;;  %v1140_v3 = vsel %vm1133_vm6, %v1137_v42, %v1139_v26  ;;  %v481_v38 = vrot.slane %v3676_v48, 1  ;;  %v2737_v40 = vpack.i.bf16 %v939_v20, %v937_v37 }
 0x115   :  { %v5320_v42 = vrot.slane %v3511_v41, 6  ;;  %v1269_v52 = vsel %vm1260_vm5, %v1266_v58, %v1268_v11  ;;  %v610_v37 = vrot.slane %v3712_v54, 2  ;;  %v395_v25 = vmax.f32 %v3428_v21, 0.0 }
 0x116   :  { %2708 = vrot.lane.b32.xlu1 %v2707_v6, %s3126_s21  ;;  %v1142_v10 = vsel %vm1133_vm6, %v1139_v26, %v1141_v45  ;;  %v479_v6 = vrot.slane %v3631_v39, 1  ;;  %v940_v21 = vrot.slane %v3712_v54, 4  ;;  %v412_v1 = vmax.f32 %v3568_v2, 0.0  ;;  %v93_v2 = vld [vmem:[%s5269_s1 + $0xd0] sm:$0xff] }
 0x117   :  { %v2742_v16 = vpack.i.bf16 %v1142_v10, %v1140_v3  ;;  %v811_v3 = vrot.slane %v3676_v48, 3  ;;  %v813_v10 = vrot.slane %v3712_v54, 3 }
 0x118   :  { %2713 = vrot.lane.b32.xlu0 %v2712_v4, %s3121_s14  ;;  %v408_v4 = vmax.f32 %v3357_v31, 0.0  ;;  %v480_v31 = vsel %vm469_vm2, %v477_v13, %v479_v6  ;;  %v482_v57 = vsel %vm469_vm2, %v479_v6, %v481_v38 }
 0x11a   :  { %2718 = vrot.lane.b32.xlu1 %v2717_v35, %s3123_s16  ;;  %v1267_v35 = vsel %vm1260_vm5, %v5320_v42, %v1266_v58  ;;  %v3748_v26 = vmul.f32 %v408_v4, %v88_v60  ;;  %v2752_v58 = vpack.i.bf16 %v482_v57, %v480_v31  ;;  %v814_v42 = vsel %vm801_vm3, %v811_v3, %v813_v10 }
 0x11c   :  { %2723 = vrot.lane.b32.xlu0 %v2722_v63, %s3120_s13  ;;  %v608_v63 = vrot.slane %v3676_v48, 2  ;;  %v968_v31 = vrot.slane %v3748_v26, 4 }
 0x11e   :  { %2728 = vrot.lane.b32.xlu1 %v2727_v18, %s3122_s15  ;;  %v2747_v18 = vpack.i.bf16 %v1269_v52, %v1267_v35  ;;  %v609_v13 = vsel %vm596_vm1, %v606_v49, %v608_v63  ;;  %v3761_v6 = vsel %vm596_vm1, %v608_v63, %v610_v37  ;;  %v839_v49 = vrot.slane %v3596_v12, 3 }
 0x11f   :  { %v2762_v60 = vpack.i.bf16 %v3761_v6, %v609_v13  ;;  %v5285_v35 = vrot.slane %v3748_v26, 3  ;;  %v941_v52 = vsel %vm928_vm4, %v938_v14, %v940_v21  ;;  %v638_v63 = vrot.slane %v3748_v26, 2 }
 0x120   :  { %2733 = vrot.lane.b32.xlu0 %v2732_v61, %s3125_s4  ;;  %v75_v61 = vld [vmem:[%s5269_s1 + $0x40] sm:$0xff]  ;;  %v2772_v57 = vpack.i.bf16 %v941_v52, %v939_v20  ;;  %v402_v14 = vmax.f32 %v3485_v9, 0.0  ;;  %v3805_v9 = vsel %vm928_vm4, %v966_v0, %v968_v31 }
 0x121   :  { %v3765_v4 = vmul.f32 %v395_v25, %v75_v61  ;;  %v3793_v20 = vsel %vm596_vm1, %v636_v55, %v638_v63 }
 0x122   :  { %2738 = vrot.lane.b32.xlu1 %v2737_v40, %s3124_s19  ;;  %v2757_v40 = vpack.i.bf16 %v609_v13, %v607_v44  ;;  %v82_v13 = vld [vmem:[%s5269_s1 + $0x78] sm:$0xff] }
 0x123   :  { %5321 = vst [vmem:[#allocation4_spill] sm:$0xff] %v3765_v4  ;;  %v942_v61 = vrot.slane %v3765_v4, 4  ;;  %v1145_v55 = vrot.slane %v3765_v4, 5  ;;  %v1272_v0 = vrot.slane %v3765_v4, 6 }
 0x124   :  { %2743 = vrot.lane.b32.xlu0 %v2742_v16, %s3127_s22  ;;  %v812_v16 = vsel %vm801_vm3, %v809_v7, %v811_v3  ;;  %v5322_v7 = vrot.slane %v3499_v19, 3 }
 0x125   :  { %v2767_v44 = vpack.i.bf16 %v814_v42, %v812_v16  ;;  %v1270_v16 = vrot.slane %v3712_v54, 6  ;;  %v3821_v42 = vmul.f32 %v402_v14, %v82_v13  ;;  %v483_v14 = vrot.slane %v3712_v54, 1 }
 0x126   :  { %2748 = vrot.lane.b32.xlu1 %v2747_v18, %s3126_s21  ;;  %v840_v25 = vsel %vm801_vm3, %v5322_v7, %v839_v49  ;;  %v842_v18 = vsel %vm801_vm3, %v839_v49, %v5285_v35  ;;  %v2777_v49 = vpack.i.bf16 %v3793_v20, %v3683_v46  ;;  %v2787_v46 = vpack.i.bf16 %v3805_v9, %v3640_v43 }
 0x127   :  { %v2782_v3 = vpack.i.bf16 %v842_v18, %v840_v25  ;;  %v77_v25 = vld [vmem:[%s5269_s1 + $0x50] sm:$0xff]  ;;  %v1271_v18 = vsel %vm1260_vm5, %v1268_v11, %v1270_v16  ;;  %v1273_v43 = vsel %vm1260_vm5, %v1270_v16, %v1272_v0  ;;  %v5289_v13 = vrot.slane %v3821_v42, 2 }
 0x128   :  { %2753 = vrot.lane.b32.xlu0 %v2752_v58, %s3121_s14  ;;  %v396_v58 = vmax.f32 %v3435_v33, 0.0  ;;  %v76_v33 = vld [vmem:[%s5269_s1 + $0x48] sm:$0xff]  ;;  %v5291_v16 = vmov 0.0  }
 0x129   :  { %2477 = vmatprep.subr.bf16.mxu1 %v5291_v16  ;;  %2539 = vmatprep.subr.bf16.mxu0 %v5291_v16 }
 0x12a   :  { %2758 = vrot.lane.b32.xlu1 %v2757_v40, %s3123_s16  ;;  %v1143_v40 = vrot.slane %v3712_v54, 5  ;;  %2487 = vmatprep.mubr.msk.bf16.mxu1 %vm3129_vm7, %v5291_v16 }
 0x12b   :  { %2541 = vmatprep.mubr.msk.bf16.mxu0 %vm3129_vm7, %v5291_v16 }
 0x12c   :  { %2763 = vrot.lane.b32.xlu0 %v2762_v60, %s3120_s13  ;;  %v3817_v60 = vsel %vm928_vm4, %v940_v21, %v942_v61  ;;  %v1144_v7 = vsel %vm1133_vm6, %v1141_v45, %v1143_v40  ;;  %v3089_v45 = vld [vmem:[%s5270_s5] sm:$0xff]  }
 0x12d   :  { %v2792_v21 = vpack.i.bf16 %v3817_v60, %v941_v52  ;;  %v612_v52 = vrot.slane %v3765_v4, 2  ;;  %2478 = vmatpush3.bf16.msra.mxu1 %v3089_v45  ;;  %v89_v45 = vld [vmem:[%s5269_s1 + $0xb0] sm:$0xff] }
 0x12e   :  { %2768 = vrot.lane.b32.xlu1 %v2767_v44, %s3122_s15  ;;  %v397_v44 = vmax.f32 %v3411_v5, 0.0  ;;  %v1146_v5 = vsel %vm1133_vm6, %v1143_v40, %v1145_v55  ;;  %v2802_v40 = vpack.i.bf16 %v1273_v43, %v1271_v18  ;;  %2479 = vmatprep.subr.bf16.mxu1 %v5291_v16 }
 0x130   :  { %2773 = vrot.lane.b32.xlu0 %v2772_v57, %s3125_s4  ;;  %v3826_v57 = vmul.f32 %v396_v58, %v76_v33  ;;  %v485_v58 = vrot.slane %v3765_v4, 1  ;;  %v3855_v11 = vmul.f32 %v397_v44, %v77_v25  ;;  %v5325_v33 = vrot.slane %v3385_v53, 2  ;;  %v3090_v25 = vld [vmem:[%s5270_s5 + $0x8] sm:$0xff]  }
 0x131   :  { %2480 = vmatpush3.bf16.msra.mxu1 %v3090_v25 }
 0x132   :  { %2783 = vrot.lane.b32.xlu1 %v2782_v3, %s3122_s15  ;;  %5323 = vst [vmem:[#allocation5_spill] sm:$0xff] %v3826_v57  ;;  %5324 = vst [vmem:[#allocation6_spill] sm:$0xff] %v3855_v11  ;;  %v2797_v3 = vpack.i.bf16 %v1146_v5, %v1144_v7  ;;  %v817_v44 = vrot.slane %v3826_v57, 3  ;;  %v409_v5 = vmax.f32 %v3332_v17, 0.0  ;;  %v486_v18 = vsel %vm469_vm2, %v483_v14, %v485_v58 }
 0x133   :  { %v614_v43 = vrot.slane %v3826_v57, 2  ;;  %v398_v17 = vmax.f32 %v3432_v30, 0.0  ;;  %2481 = vmatprep.subr.bf16.mxu1 %v5291_v16  ;;  %v1274_v25 = vrot.slane %v3826_v57, 6 }
 0x134   :  { %2778 = vrot.lane.b32.xlu0 %v2777_v49, %s3120_s13  ;;  %v3862_v49 = vsel %vm596_vm1, %v5289_v13, %v5325_v33  ;;  %v3906_v23 = vmul.f32 %v409_v5, %v89_v45  ;;  %v5294_v5 = vrot.slane %v3855_v11, 6  ;;  %v1149_v45 = vrot.slane %v3855_v11, 5 }
 0x135   :  { %2482 = vmatpush3.bf16.msra.mxu1 %v3091_v34  ;;  %v3093_v34 = vld [vmem:[%s5270_s5 + $0x20] ss:$0 sps:$4 sm:$0xff]  }
 0x136   :  { %2793 = vrot.lane.b32.xlu1 %v2792_v21, %s3124_s19  ;;  %v613_v21 = vsel %vm596_vm1, %v610_v37, %v612_v52  ;;  %v484_v37 = vsel %vm469_vm2, %v481_v38, %v483_v14  ;;  %v78_v38 = vld [vmem:[%s5269_s1 + $0x58] sm:$0xff]  ;;  %v399_v14 = vmax.f32 %v3482_v8, 0.0  ;;  %v79_v8 = vld [vmem:[%s5269_s1 + $0x60] sm:$0xff]  ;;  %2483 = vmatprep.subr.bf16.mxu1 %v5291_v16 }
 0x137   :  { %v2807_v33 = vpack.i.bf16 %v486_v18, %v484_v37  ;;  %v1147_v18 = vrot.slane %v3826_v57, 5 }
 0x138   :  { %2788 = vrot.lane.b32.xlu0 %v2787_v46, %s3125_s4  ;;  %v815_v46 = vrot.slane %v3765_v4, 3 }
 0x13a   :  { %2803 = vrot.lane.b32.xlu1 %v2802_v40, %s3126_s21  ;;  %v2812_v40 = vpack.i.bf16 %v613_v21, %v3761_v6  ;;  %v816_v35 = vsel %vm801_vm3, %v813_v10, %v815_v46  ;;  %v818_v30 = vsel %vm801_vm3, %v815_v46, %v817_v44  ;;  %v3913_v10 = vsel %vm596_vm1, %v612_v52, %v614_v43 }
 0x13b   :  { %v944_v6 = vrot.slane %v3826_v57, 4  ;;  %v3917_v46 = vmul.f32 %v398_v17, %v78_v38  ;;  %v2822_v37 = vpack.i.bf16 %v818_v30, %v816_v35  ;;  %v2817_v52 = vpack.i.bf16 %v3913_v10, %v613_v21  ;;  %v3092_v38 = vld [vmem:[%s5270_s5 + $0x18] sm:$0xff]  }
 0x13c   :  { %2798 = vrot.lane.b32.xlu0 %v2797_v3, %s3127_s22  ;;  %v946_v3 = vrot.slane %v3855_v11, 4  ;;  %v413_v35 = vmax.f32 %v3542_v50, 0.0  ;;  %v1275_v50 = vsel %vm1260_vm5, %v1272_v0, %v1274_v25  ;;  %v487_v30 = vrot.slane %v3826_v57, 1  ;;  %2484 = vmatpush3.bf16.msra.mxu1 %v3092_v38 }
 0x13d   :  { %5326 = vst [vmem:[#allocation7_spill] sm:$0xff] %v3917_v46  ;;  %v945_v21 = vsel %vm928_vm4, %v942_v61, %v944_v6  ;;  %v1277_v61 = vsel %vm1260_vm5, %v1274_v25, %v5294_v5  ;;  %v1150_v0 = vsel %vm1133_vm6, %v1147_v18, %v1149_v45  ;;  %2485 = vmatprep.subr.bf16.mxu1 %v5291_v16  ;;  %v414_v5 = vmax.f32 %v3548_v22, 0.0 }
 0x13e   :  { %2813 = vrot.lane.b32.xlu1 %v2812_v40, %s3123_s16  ;;  %v3924_v40 = vmul.f32 %v399_v14, %v79_v8  ;;  %v3930_v17 = vsel %vm928_vm4, %v944_v6, %v946_v3  ;;  %v616_v14 = vrot.slane %v3855_v11, 2  ;;  %v5293_v8 = vrot.slane %v3855_v11, 1 }
 0x13f   :  { %v2832_v6 = vpack.i.bf16 %v3930_v17, %v945_v21  ;;  %v2827_v7 = vpack.i.bf16 %v945_v21, %v3817_v60  ;;  %v91_v60 = vld [vmem:[%s5269_s1 + $0xc0] sm:$0xff]  ;;  %v819_v21 = vrot.slane %v3855_v11, 3  ;;  %v4018_v16 = vmul.f32 %v413_v35, %v93_v2 }
 0x140   :  { %2808 = vrot.lane.b32.xlu0 %v2807_v33, %s3121_s14  ;;  %v5290_v33 = vrot.slane %v3906_v23, 4  ;;  %v3980_v13 = vsel %vm596_vm1, %v614_v43, %v616_v14  ;;  %v488_v43 = vsel %vm469_vm2, %v485_v58, %v487_v30  ;;  %v1278_v2 = vrot.slane %v3917_v46, 6 }
 0x141   :  { %v820_v22 = vsel %vm801_vm3, %v817_v44, %v819_v21 }
 0x142   :  { %2823 = vrot.lane.b32.xlu1 %v2822_v37, %s3122_s15  ;;  %v1148_v37 = vsel %vm1133_vm6, %v1145_v55, %v1147_v18  ;;  %v3971_v25 = vsel %vm928_vm4, %v968_v31, %v5290_v33  ;;  %v2842_v18 = vpack.i.bf16 %v1277_v61, %v1275_v50  ;;  %v1684_v31 = vsel %vm928_vm4, %v3093_v34, 0  ;;  %v92_v50 = vld [vmem:[%s5269_s1 + $0xc8] sm:$0xff] }
 0x143   :  { %v2837_v38 = vpack.i.bf16 %v1150_v0, %v1148_v37  ;;  %v5302_v34 = vrot.slane %v3917_v46, 3  ;;  %v490_v61 = vsel %vm469_vm2, %v487_v30, %v5293_v8  ;;  %v5300_v37 = vrot.slane %v3924_v40, 4  ;;  %2486 = vmatpush3.bf16.msra.mxu1 %v1684_v31  ;;  %v94_v31 = vld [vmem:[%s5269_s1 + $0xd8] sm:$0x3f] }
 0x144   :  { %2818 = vrot.lane.b32.xlu0 %v2817_v52, %s3120_s13  ;;  %v411_v52 = vmax.f32 %v3545_v15, 0.0  ;;  %v5295_v15 = vrot.slane %v3906_v23, 2  ;;  %v1151_v0 = vrot.slane %v3917_v46, 5  ;;  %v5296_v33 = vrot.slane %v3924_v40, 5 }
 0x145   :  { %v401_v55 = vmax.f32 %v3438_v36, 0.0  ;;  %v2852_v36 = vpack.i.bf16 %v3980_v13, %v3913_v10  ;;  %v822_v35 = vsel %vm801_vm3, %v819_v21, %v5302_v34  ;;  %v5301_v21 = vrot.slane %v3924_v40, 2 }
 0x146   :  { %2833 = vrot.lane.b32.xlu1 %v2832_v6, %s3124_s19  ;;  %v618_v6 = vrot.slane %v3917_v46, 2  ;;  %v4010_v58 = vsel %vm596_vm1, %v638_v63, %v5295_v15  ;;  %v4020_v8 = vmul.f32 %v411_v52, %v91_v60  ;;  %v81_v63 = vld [vmem:[%s5269_s1 + $0x70] sm:$0xff]  ;;  %v4030_v15 = vmul.f32 %v412_v1, %v92_v50 }
 0x147   :  { %v2847_v52 = vpack.i.bf16 %v490_v61, %v488_v43  ;;  %v1152_v44 = vsel %vm1133_vm6, %v1149_v45, %v1151_v0  ;;  %v5297_v60 = vrot.slane %v3924_v40, 6  ;;  %v2862_v43 = vpack.i.bf16 %v822_v35, %v820_v22 }
 0x148   :  { %2828 = vrot.lane.b32.xlu0 %v2827_v7, %s3125_s4  ;;  %v948_v7 = vrot.slane %v3917_v46, 4  ;;  %v491_v61 = vrot.slane %v3917_v46, 1  ;;  %v1306_v22 = vrot.slane %v4030_v15, 6  ;;  %v4085_v35 = vsel %vm596_vm1, %v618_v6, %v5301_v21 }
 0x149   :  { %v5305_v30 = vrot.slane %v4030_v15, 3 }
 0x14a   :  { %2843 = vrot.lane.b32.xlu1 %v2842_v18, %s3126_s21  ;;  %v4042_v18 = vsel %vm596_vm1, %v616_v14, %v618_v6  ;;  %v949_v1 = vsel %vm928_vm4, %v946_v3, %v948_v7  ;;  %v4051_v10 = vsel %vm928_vm4, %v948_v7, %v5300_v37  ;;  %v1154_v14 = vsel %vm1133_vm6, %v1151_v0, %v5296_v33 }
 0x14b   :  { %v442_v3 = vmul.f32 %v414_v5, %v94_v31  ;;  %v2857_v50 = vpack.i.bf16 %v4042_v18, %v3980_v13  ;;  %v2867_v45 = vpack.i.bf16 %v949_v1, %v3930_v17  ;;  %v5298_v7 = vrot.slane %v4020_v8, 4 }
 0x14c   :  { %2838 = vrot.lane.b32.xlu0 %v2837_v38, %s3127_s22  ;;  %v4060_v38 = vmul.f32 %v401_v55, %v81_v63  ;;  %v2872_v55 = vpack.i.bf16 %v4051_v10, %v949_v1  ;;  %v2877_v0 = vpack.i.bf16 %v1154_v14, %v1152_v44  ;;  %v5327_v5 = vrot.slane %v3855_v11, 6 }
 0x14d   :  { %v976_v13 = vrot.slane %v4030_v15, 4  ;;  %v978_v17 = vrot.slane %v4018_v16, 4  ;;  %v1308_v1 = vrot.slane %v4018_v16, 6  ;;  %v1179_v44 = vrot.slane %v4030_v15, 5 }
 0x14e   :  { %2853 = vrot.lane.b32.xlu1 %v2852_v36, %s3123_s16  ;;  %v1279_v63 = vsel %vm1260_vm5, %v5327_v5, %v1278_v2  ;;  %v1281_v36 = vsel %vm1260_vm5, %v1278_v2, %v5297_v60  ;;  %v5328_v2 = vrot.slane %v3855_v11, 1  ;;  %v5303_v5 = vrot.slane %v4020_v8, 5 }
 0x14f   :  { %v4101_v6 = vsel %vm928_vm4, %v976_v13, %v978_v17  ;;  %v1181_v33 = vrot.slane %v4018_v16, 5  ;;  %v724_v37 = vrot.slane %v4018_v16, 2  ;;  %v1310_v21 = vrot.slane %v442_v3, 6 }
 0x150   :  { %2848 = vrot.lane.b32.xlu0 %v2847_v52, %s3121_s14  ;;  %v5299_v52 = vrot.slane %v4020_v8, 6  ;;  %v492_v14 = vsel %vm469_vm2, %v5328_v2, %v491_v61  ;;  %v4112_v2 = vsel %vm1260_vm5, %v1306_v22, %v1308_v1  ;;  %v2882_v34 = vpack.i.bf16 %v1281_v36, %v1279_v63 }
 0x151   :  { %v4129_v31 = vsel %vm1133_vm6, %v1179_v44, %v1181_v33  ;;  %v5333_v63 = vrot.slane %v3924_v40, 1  ;;  %v956_v36 = vrot.slane %v3821_v42, 4 }
 0x152   :  { %2863 = vrot.lane.b32.xlu1 %v2862_v43, %s3122_s15  ;;  %v4098_v43 = vsel %vm928_vm4, %v5298_v7, %v976_v13  ;;  %v4120_v13 = vsel %vm1133_vm6, %v5303_v5, %v1179_v44  ;;  %v5307_v7 = vrot.slane %v4060_v38, 4  ;;  %v1183_v5 = vrot.slane %v442_v3, 5 }
 0x153   :  { %v4151_v44 = vsel %vm1260_vm5, %v1308_v1, %v1310_v21 }
 0x154   :  { %2858 = vrot.lane.b32.xlu0 %v2857_v50, %s3120_s13  ;;  %v4109_v50 = vsel %vm1260_vm5, %v5299_v52, %v1306_v22  ;;  %v851_v52 = vrot.slane %v4018_v16, 3  ;;  %v1056_v22 = vrot.slane %v442_v3, 4  ;;  %v5330_v16 = vrot.slane %v4030_v15, 2  ;;  %5334 = vst [vmem:[#allocation11_spill] sm:$0xff] %v4151_v44 }
 0x155   :  { %v494_v3 = vsel %vm469_vm2, %v491_v61, %v5333_v63  ;;  %v2892_v61 = vpack.i.bf16 %v4085_v35, %v4042_v18 }
 0x156   :  { %2873 = vrot.lane.b32.xlu1 %v2872_v55, %s3124_s19  ;;  %v4136_v55 = vsel %vm801_vm3, %v5305_v30, %v851_v52  ;;  %v4141_v11 = vsel %vm596_vm1, %v5330_v16, %v724_v37  ;;  %v4154_v52 = vsel %vm1133_vm6, %v1181_v33, %v1183_v5  ;;  %v5306_v37 = vrot.slane %v4060_v38, 5 }
 0x157   :  { %5329 = vst [vmem:[#allocation8_spill] sm:$0xff] %v4136_v55  ;;  %5331 = vst [vmem:[#allocation9_spill] sm:$0xff] %v4141_v11  ;;  %v1159_v16 = vrot.slane %v3821_v42, 5  ;;  %v4168_v33 = vsel %vm928_vm4, %v5307_v7, %v956_v36  ;;  %v624_v7 = vrot.slane %v4060_v38, 2 }
 0x158   :  { %2868 = vrot.lane.b32.xlu0 %v2867_v45, %s3125_s4  ;;  %v4144_v45 = vsel %vm928_vm4, %v978_v17, %v1056_v22  ;;  %5335 = vst [vmem:[#allocation12_spill] sm:$0xff] %v4154_v52  ;;  %v400_v17 = vmax.f32 %v3687_v59, 0.0  ;;  %v2887_v22 = vpack.i.bf16 %v494_v3, %v492_v14  ;;  %v1286_v59 = vrot.slane %v3821_v42, 6 }
 0x159   :  { %5332 = vst [vmem:[#allocation10_spill] sm:$0xff] %v4144_v45  ;;  %v1160_v1 = vsel %vm1133_vm6, %v5306_v37, %v1159_v16  ;;  %v5337_v14 = vrot.slane %v3385_v53, 5 }
 0x15a   :  { %2883 = vrot.lane.b32.xlu1 %v2882_v34, %s3126_s21  ;;  %v5336_v34 = vrot.slane %v3385_v53, 4 }
 0x15b   :  { %v1162_v5 = vsel %vm1133_vm6, %v1159_v16, %v5337_v14  ;;  %v5338_v16 = vrot.slane %v3385_v53, 6 }
 0x15c   :  { %2878 = vrot.lane.b32.xlu0 %v2877_v0, %s3127_s22  ;;  %v4173_v21 = vsel %vm928_vm4, %v956_v36, %v5336_v34  ;;  %v1284_v0 = vrot.slane %v4060_v38, 6  ;;  %v499_v36 = vrot.slane %v3821_v42, 1  ;;  %v80_v34 = vld [vmem:[%s5269_s1 + $0x68] sm:$0xff]  ;;  %v2902_v60 = vpack.i.bf16 %v1162_v5, %v1160_v1 }
 0x15d   :  { %v1289_v14 = vsel %vm1260_vm5, %v1286_v59, %v5338_v16  ;;  %v4201_v3 = vmul.f32 %v400_v17, %v80_v34  ;;  %v5340_v1 = vrot.slane %v3385_v53, 1  ;;  %v5342_v17 = vrot.slane %v3821_v42, 2 }
 0x15e   :  { %2893 = vrot.lane.b32.xlu1 %v2892_v61, %s3123_s16  ;;  %v2897_v61 = vpack.i.bf16 %v4173_v21, %v4168_v33  ;;  %v1287_v37 = vsel %vm1260_vm5, %v1284_v0, %v1286_v59 }
 0x15f   :  { %v502_v5 = vsel %vm469_vm2, %v499_v36, %v5340_v1  ;;  %v2907_v52 = vpack.i.bf16 %v1289_v14, %v1287_v37  ;;  %v4218_v34 = vsel %vm596_vm1, %v624_v7, %v5342_v17  ;;  %v1282_v44 = vrot.slane %v4201_v3, 6 }
 0x160   :  { %v4163_v63 = vpop.permute.xlu1 %2618  ;;  %v4178_v18 = vpop.permute.xlu0 %2608  ;;  %2888 = vrot.lane.b32.xlu0 %v2887_v22, %s3121_s14  ;;  %v5339_v22 = vrot.slane %v4060_v38, 1  ;;  %v2917_v37 = vpack.i.bf16 %v3862_v49, %v4218_v34  ;;  %v1155_v45 = vrot.slane %v4201_v3, 5 }
 0x162   :  { %2898 = vrot.lane.b32.xlu1 %v2897_v61, %s3124_s19  ;;  %v500_v4 = vsel %vm469_vm2, %v5339_v22, %v499_v36  ;;  %v5311_v61 = vrot.slane %v3821_v42, 3  ;;  %v823_v22 = vrot.slane %v3924_v40, 3  ;;  %v5315_v36 = vrot.slane %v4201_v3, 3 }
 0x163   :  { %v2912_v59 = vpack.i.bf16 %v502_v5, %v500_v4  ;;  %v622_v4 = vrot.slane %v4201_v3, 2 }
 0x164   :  { %v4194_v30 = vpop.permute.xlu1 %2623  ;;  %2903 = vrot.lane.b32.xlu0 %v2902_v60, %s3127_s22  ;;  %v4211_v57 = vpop.permute.xlu0 %2613  ;;  %v831_v60 = vrot.slane %v3385_v53, 3 }
 0x166   :  { %2908 = vrot.lane.b32.xlu1 %v2907_v52, %s3126_s21  ;;  %v832_v1 = vsel %vm801_vm3, %v5311_v61, %v831_v60  ;;  %v952_v52 = vrot.slane %v4201_v3, 4 }
 0x168   :  { %v4213_v16 = vpop.permute.xlu1 %2633  ;;  %2913 = vrot.lane.b32.xlu0 %v2912_v59, %s3121_s14  ;;  %v5344_v59 = vrot.slane %v3917_v46, 3 }
 0x169   :  { %5341 = vst [vmem:[#allocation13_spill] sm:$0xff] %v4213_v16  ;;  %v826_v16 = vsel %vm801_vm3, %v823_v22, %v5315_v36  ;;  %v495_v36 = vrot.slane %v4201_v3, 1 }
 0x16a   :  { %v4229_v14 = vpop.permute.xlu0 %2628  ;;  %2918 = vrot.lane.b32.xlu1 %v2917_v37, %s3123_s16  ;;  %v824_v17 = vsel %vm801_vm3, %v5344_v59, %v823_v22  ;;  %v5345_v37 = vpack.i.bf16 %v3519_v56, %v3862_v49  ;;  %v5347_v59 = vrot.slane %v3924_v40, 2  ;;  %v2932_v56 = vpack.i.bf16 %v3452_v47, %v4173_v21 }
 0x16b   :  { %v2942_v49 = vpack.i.bf16 %v826_v16, %v824_v17  ;;  %v4281_v21 = vsel %vm1260_vm5, %v1282_v44, %v1284_v0  ;;  %v5352_v16 = vrot.slane %v3924_v40, 5  ;;  %v2615_v0 = vunpack.i.l.bf16 %v4211_v57 }
 0x16c   :  { %v4236_v5 = vpop.permute.xlu1 %2643  ;;  %2923 = vrot.lane.b32.xlu0 %v5345_v37, %s3120_s13  ;;  %v4257_v48 = vsel %vm596_vm1, %v5347_v59, %v622_v4  ;;  %v5349_v37 = vrot.slane %v3924_v40, 4 }
 0x16d   :  { %5343 = vst [vmem:[#allocation14_spill] sm:$0xff] %v4236_v5  ;;  %v5346_v5 = vrot.slane %v3399_v62, 3  ;;  %v4286_v17 = vsel %vm1133_vm6, %v5352_v16, %v1155_v45 }
 0x16e   :  { %v4260_v61 = vpop.permute.xlu0 %2638 }
 0x16f   :  { %v834_v46 = vsel %vm801_vm3, %v831_v60, %v5346_v5  ;;  %5348 = vst [vmem:[#allocation15_spill] sm:$0xff] %v4260_v61  ;;  %v953_v60 = vsel %vm928_vm4, %v5349_v37, %v952_v52  ;;  %v5350_v5 = vrot.slane %v4060_v38, 4  ;;  %v5351_v61 = vrot.slane %v3924_v40, 6 }
 0x170   :  { %v2927_v22 = vpack.i.bf16 %v834_v46, %v832_v1  ;;  %v2654_v46 = vpop.permute.xlu1 %2653  ;;  %v2937_v1 = vpack.i.bf16 %v4257_v48, %v4085_v35  ;;  %2933 = vrot.lane.b32.xlu0 %v2932_v56, %s3125_s4  ;;  %v5353_v35 = vrot.slane %v4060_v38, 5 }
 0x171   :  { %v4270_v59 = vsel %vm928_vm4, %v952_v52, %v5350_v5  ;;  %v4278_v47 = vsel %vm1260_vm5, %v5351_v61, %v1282_v44  ;;  %v2611_v52 = vunpack.i.h.bf16 %v4178_v18  ;;  %v4297_v61 = vsel %vm596_vm1, %v622_v4, %v624_v7 }
 0x172   :  { %2928 = vrot.lane.b32.xlu1 %v2927_v22, %s3122_s15  ;;  %v2610_v22 = vunpack.i.l.bf16 %v4178_v18  ;;  %v4294_v37 = vsel %vm1133_vm6, %v1155_v45, %v5353_v35  ;;  %v2616_v44 = vunpack.i.h.bf16 %v4211_v57  ;;  %v5354_v5 = vrot.slane %v3924_v40, 1  ;;  %v2649_v35 = vpop.permute.xlu0 %2648 }
 0x173   :  { %v5355_v18 = vrot.slane %v4060_v38, 1  ;;  %v2656_v54 = vunpack.i.h.bf16 %v2654_v46  ;;  %v2655_v45 = vunpack.i.l.bf16 %v2654_v46  ;;  %v2952_v7 = vpack.i.bf16 %v4270_v59, %v953_v60 }
 0x174   :  { %v4304_v16 = vsel %vm469_vm2, %v5354_v5, %v495_v36  ;;  %v2947_v4 = vpack.i.bf16 %v953_v60, %v4051_v10  ;;  %v2651_v11 = vunpack.i.h.bf16 %v2649_v35  ;;  %v2650_v55 = vunpack.i.l.bf16 %v2649_v35  ;;  %2938 = vrot.lane.b32.xlu0 %v2937_v1, %s3120_s13 }
 0x175   :  { %v4309_v56 = vsel %vm469_vm2, %v495_v36, %v5355_v18  ;;  %v2962_v57 = vpack.i.bf16 %v4281_v21, %v4278_v47  ;;  %v2957_v5 = vpack.i.bf16 %v4294_v37, %v4286_v17  ;;  %v1389_v36 = vsel %vm1387_vm8, %v3342_v24, %v2611_v52 }
 0x176   :  { %2943 = vrot.lane.b32.xlu1 %v2942_v49, %s3122_s15  ;;  %v1388_v46 = vsel %vm1387_vm8, %v3359_v32, %v2610_v22  ;;  %v2972_v10 = vpack.i.bf16 %v4297_v61, %v4257_v48  ;;  %v2967_v49 = vpack.i.bf16 %v4309_v56, %v4304_v16  ;;  %v1415_v47 = vsel %vm1413_vm9, %v1389_v36, %v2616_v44  ;;  %v2664_v32 = vpop.permute.xlu1 %2663  ;;  %v2659_v52 = vpop.permute.xlu0 %2658 }
 0x177   :  { %v1414_v60 = vsel %vm1413_vm9, %v1388_v46, %v2615_v0  ;;  %v1405_v21 = vsel %vm1387_vm8, %v3399_v62, %v2651_v11  ;;  %v1404_v24 = vsel %vm1387_vm8, %v3385_v53, %v2650_v55  ;;  %v2666_v17 = vunpack.i.h.bf16 %v2664_v32 }
 0x178   :  { %v2665_v1 = vunpack.i.l.bf16 %v2664_v32  ;;  %v1430_v48 = vsel %vm1413_vm9, %v1404_v24, %v2655_v45  ;;  %v1431_v22 = vsel %vm1413_vm9, %v1405_v21, %v2656_v54  ;;  %v2621_v37 = vunpack.i.h.bf16 %v4163_v63  ;;  %2948 = vrot.lane.b32.xlu0 %v2947_v4, %s3125_s4 }
 0x179   :  { %v2620_v44 = vunpack.i.l.bf16 %v4163_v63  ;;  %v2661_v0 = vunpack.i.h.bf16 %v2659_v52  ;;  %v2660_v18 = vunpack.i.l.bf16 %v2659_v52  ;;  %v827_v53 = vrot.slane %v4060_v38, 3 }
 0x17a   :  { %2953 = vrot.lane.b32.xlu1 %v2952_v7, %s3124_s19  ;;  %v2977_v62 = vpack.i.bf16 %v4218_v34, %v4297_v61  ;;  %v1298_v11 = vrot.slane %v3748_v26, 6  ;;  %v1300_v54 = vrot.slane %v3906_v23, 6  ;;  %v1441_v63 = vsel %vm1439_vm10, %v1415_v47, %v2621_v37  ;;  %v2674_v7 = vpop.permute.xlu1 %2673  ;;  %v2669_v46 = vpop.permute.xlu0 %2668 }
 0x17b   :  { %v1440_v55 = vsel %vm1439_vm10, %v1414_v60, %v2620_v44  ;;  %v1456_v45 = vsel %vm1439_vm10, %v1430_v48, %v2660_v18  ;;  %v1457_v35 = vsel %vm1439_vm10, %v1431_v22, %v2661_v0  ;;  %v2626_v4 = vunpack.i.h.bf16 %v4194_v30 }
 0x17c   :  { %v2625_v36 = vunpack.i.l.bf16 %v4194_v30  ;;  %v1481_v34 = vsel %vm131_vm0, %v1456_v45, %v2665_v1  ;;  %v1482_v61 = vsel %vm131_vm0, %v1457_v35, %v2666_v17  ;;  %v2631_v21 = vunpack.i.h.bf16 %v4229_v14  ;;  %2958 = vrot.lane.b32.xlu0 %v2957_v5, %s3127_s22 }
 0x17d   :  { %v2630_v60 = vunpack.i.l.bf16 %v4229_v14  ;;  %v2671_v24 = vunpack.i.h.bf16 %v2669_v46  ;;  %v2670_v47 = vunpack.i.l.bf16 %v2669_v46  ;;  %v1466_v52 = vsel %vm131_vm0, %v1441_v63, %v2626_v4  ;;  %v90_v4 = vld [vmem:[%s5269_s1 + $0xb8] sm:$0xff] }
 0x17e   :  { %2963 = vrot.lane.b32.xlu1 %v2962_v57, %s3126_s21  ;;  %v1465_v32 = vsel %vm131_vm0, %v1440_v55, %v2625_v36  ;;  %v2676_v48 = vunpack.i.h.bf16 %v2674_v7  ;;  %v2675_v22 = vunpack.i.l.bf16 %v2674_v7  ;;  %v2684_v1 = vpop.permute.xlu1 %2683  ;;  %v5356_v37 = vrot.slane %v4201_v3, 3  ;;  %v2679_v0 = vpop.permute.xlu0 %2678 }
 0x17f   :  { %v1507_v30 = vsel %vm1490_vm11, %v1481_v34, %v2670_v47  ;;  %v1508_v17 = vsel %vm1490_vm11, %v1482_v61, %v2671_v24  ;;  %v5357_v44 = vrot.slane %v3821_v42, 3  ;;  %v2686_v18 = vunpack.i.h.bf16 %v2684_v1 }
 0x180   :  { %v828_v14 = vsel %vm801_vm3, %v5356_v37, %v827_v53  ;;  %v2685_v55 = vunpack.i.l.bf16 %v2684_v1  ;;  %v1171_v63 = vrot.slane %v3748_v26, 5  ;;  %v1491_v5 = vsel %vm1490_vm11, %v1465_v32, %v2630_v60  ;;  %2968 = vrot.lane.b32.xlu0 %v2967_v49, %s3121_s14 }
 0x181   :  { %v830_v57 = vsel %vm801_vm3, %v827_v53, %v5357_v44  ;;  %v1492_v45 = vsel %vm1490_vm11, %v1466_v52, %v2631_v21  ;;  %v2681_v35 = vunpack.i.h.bf16 %v2679_v0  ;;  %v2680_v7 = vunpack.i.l.bf16 %v2679_v0 }
 0x182   :  { %2973 = vrot.lane.b32.xlu1 %v2972_v10, %s3123_s16  ;;  %v1518_v53 = vsel %vm1516_vm12, %v1492_v45, %v2676_v48  ;;  %v1517_v36 = vsel %vm1516_vm12, %v1491_v5, %v2675_v22  ;;  %v2982_v46 = vpack.i.bf16 %v830_v57, %v828_v14  ;;  %v1173_v34 = vrot.slane %v3906_v23, 5  ;;  %v4382_v21 = vpop.permute.xlu1 %2693  ;;  %v2689_v49 = vpop.permute.xlu0 %2688 }
 0x183   :  { %v1543_v61 = vsel %vm1542_vm13, %v1517_v36, %v2680_v7  ;;  %v1544_v10 = vsel %vm1542_vm13, %v1518_v53, %v2681_v35  ;;  %v5358_v60 = vrot.slane %v3596_v12, 6  ;;  %v1301_v47 = vsel %vm1260_vm5, %v1298_v11, %v1300_v54 }
 0x184   :  { %v1569_v16 = vsel %vm1568_vm14, %v1543_v61, %v2685_v55  ;;  %v1570_v56 = vsel %vm1568_vm14, %v1544_v10, %v2686_v18  ;;  %v511_v32 = vrot.slane %v3748_v26, 1  ;;  %v513_v52 = vrot.slane %v3906_v23, 1  ;;  %2978 = vrot.lane.b32.xlu0 %v2977_v62, %s3120_s13 }
 0x185   :  { %v1299_v24 = vsel %vm1260_vm5, %v5358_v60, %v1298_v11  ;;  %v5359_v48 = vmax.f32 %v3349_v27, 0.0  ;;  %v1594_v1 = vpack.c.bf16 %v1570_v56, %v1569_v16  ;;  %v2992_v37 = vpack.i.bf16 %v4168_v33, %v4270_v59 }
 0x186   :  { %2983 = vrot.lane.b32.xlu1 %v2982_v46, %s3122_s15  ;;  %v2699_v11 = vpop.permute.xlu1 %2698  ;;  %v3002_v14 = vpack.i.bf16 %v1301_v47, %v1299_v24  ;;  %v5360_v44 = vrot.slane %v3596_v12, 5  ;;  %v1174_v27 = vsel %vm1133_vm6, %v1171_v63, %v1173_v34  ;;  %v2704_v55 = vpop.permute.xlu0 %2703  ;;  %v5361_v62 = vrot.slane %v3596_v12, 1 }
 0x187   :  { %v4396_v22 = vmul.f32 %v5359_v48, %v90_v4  ;;  %2488 = vmatmul.mubr.msk.bf16.vlgmr.msra.gmra.mrb[12].mxu1 %vm1643_vm15, %v1594_v1  ;;  %v2701_v0 = vunpack.i.h.bf16 %v2699_v11  ;;  %v2700_v18 = vunpack.i.l.bf16 %v2699_v11  ;;  %v514_v33 = vsel %vm469_vm2, %v511_v32, %v513_v52 }
 0x188   :  { %v1172_v57 = vsel %vm1133_vm6, %v5360_v44, %v1171_v63  ;;  %v512_v5 = vsel %vm469_vm2, %v5361_v62, %v511_v32  ;;  %v5362_v59 = vmov 0.0   ;;  %v2706_v45 = vunpack.i.h.bf16 %v2704_v55  ;;  %2993 = vrot.lane.b32.xlu0 %v2992_v37, %s3125_s4 }
 0x189   :  { %2491 = vmatprep.mubr.msk.bf16.mxu1 %vm3129_vm7, %v5362_v59  ;;  %v2705_v35 = vunpack.i.l.bf16 %v2704_v55  ;;  %v5363_v63 = vpack.i.bf16 %v3971_v25, %v3805_v9  ;;  %v843_v7 = vrot.slane %v3906_v23, 3  ;;  %v845_v4 = vrot.slane %v4396_v22, 3 }
 0x18a   :  { %v1534_v53 = vsel %vm1516_vm12, %v1508_v17, %v2701_v0  ;;  %v1533_v36 = vsel %vm1516_vm12, %v1507_v30, %v2700_v18  ;;  %v642_v46 = vrot.slane %v4396_v22, 2  ;;  %v972_v61 = vrot.slane %v4396_v22, 4  ;;  %v2709_v9 = vpop.permute.xlu1 %2708  ;;  %v2714_v17 = vpop.permute.xlu0 %2713 }
 0x18b   :  { %2988 = vrot.lane.b32.xlu1 %v5363_v63, %s3124_s19  ;;  %v1560_v10 = vsel %vm1542_vm13, %v1534_v53, %v2706_v45  ;;  %v1559_v60 = vsel %vm1542_vm13, %v1533_v36, %v2705_v35  ;;  %v2997_v24 = vpack.i.bf16 %v1174_v27, %v1172_v57  ;;  %v3007_v47 = vpack.i.bf16 %v514_v33, %v512_v5 }
 0x18c   :  { %v2691_v16 = vunpack.i.h.bf16 %v2689_v49  ;;  %v2690_v56 = vunpack.i.l.bf16 %v2689_v49  ;;  %v2711_v32 = vunpack.i.h.bf16 %v2709_v9  ;;  %v2710_v48 = vunpack.i.l.bf16 %v2709_v9 }
 0x18d   :  { %v2716_v1 = vunpack.i.h.bf16 %v2714_v17  ;;  %v2715_v30 = vunpack.i.l.bf16 %v2714_v17  ;;  %v5364_v11 = vrot.slane %v3748_v26, 3  ;;  %v846_v44 = vsel %vm801_vm3, %v843_v7, %v845_v4  ;;  %2998 = vrot.lane.b32.xlu0 %v2997_v24, %s3127_s22 }
 0x18e   :  { %v4438_v57 = vsel %vm1568_vm14, %v1559_v60, %v2710_v48  ;;  %v4441_v49 = vsel %vm1568_vm14, %v1560_v10, %v2711_v32  ;;  %v5366_v0 = vrot.slane %v3906_v23, 4  ;;  %v2696_v55 = vunpack.i.h.bf16 %v4382_v21  ;;  %v2719_v33 = vpop.permute.xlu1 %2718  ;;  %v2724_v10 = vpop.permute.xlu0 %2723 }
 0x18f   :  { %3003 = vrot.lane.b32.xlu1 %v3002_v14, %s3126_s21  ;;  %v844_v37 = vsel %vm801_vm3, %v5364_v11, %v843_v7  ;;  %v5365_v14 = vrot.slane %v3906_v23, 2  ;;  %v2695_v62 = vunpack.i.l.bf16 %v4382_v21  ;;  %v1602_v5 = vpack.c.bf16 %v4441_v49, %v4438_v57 }
 0x190   :  { %v973_v18 = vsel %vm928_vm4, %v5366_v0, %v972_v61  ;;  %v5367_v45 = vrot.slane %v4020_v8, 4  ;;  %v1391_v63 = vsel %vm1387_vm8, %v3353_v29, %v2691_v16  ;;  %v1390_v7 = vsel %vm1387_vm8, %v3351_v28, %v2690_v56 }
 0x191   :  { %v4449_v27 = vsel %vm596_vm1, %v5365_v14, %v642_v46  ;;  %v2721_v53 = vunpack.i.h.bf16 %v2719_v33  ;;  %v2720_v36 = vunpack.i.l.bf16 %v2719_v33  ;;  %v1407_v21 = vsel %vm1387_vm8, %v3499_v19, %v2716_v1  ;;  %3008 = vrot.lane.b32.xlu0 %v3007_v47, %s3121_s14 }
 0x192   :  { %v4461_v35 = vsel %vm928_vm4, %v972_v61, %v5367_v45  ;;  %v1406_v60 = vsel %vm1387_vm8, %v3383_v51, %v2715_v30  ;;  %v2726_v9 = vunpack.i.h.bf16 %v2724_v10  ;;  %v2725_v24 = vunpack.i.l.bf16 %v2724_v10  ;;  %v2729_v19 = vpop.permute.xlu1 %2728  ;;  %v2734_v11 = vpop.permute.xlu0 %2733 }
 0x193   :  { %v5368_v61 = vpack.i.bf16 %v4010_v58, %v3793_v20  ;;  %v4476_v29 = vsel %vm1413_vm9, %v1406_v60, %v2720_v36  ;;  %v4479_v28 = vsel %vm1413_vm9, %v1407_v21, %v2721_v53  ;;  %v3022_v16 = vpack.i.bf16 %v846_v44, %v844_v37 }
 0x194   :  { %v3017_v51 = vpack.i.bf16 %v4449_v27, %v4010_v58  ;;  %v3032_v56 = vpack.i.bf16 %v4461_v35, %v973_v18  ;;  %v1302_v32 = vrot.slane %v4396_v22, 6  ;;  %v1175_v20 = vrot.slane %v4396_v22, 5 }
 0x195   :  { %3013 = vrot.lane.b32.xlu1 %v5368_v61, %s3123_s16  ;;  %v1416_v48 = vsel %vm1413_vm9, %v1390_v7, %v2695_v62  ;;  %v1417_v17 = vsel %vm1413_vm9, %v1391_v63, %v2696_v55  ;;  %v2731_v1 = vunpack.i.h.bf16 %v2729_v19  ;;  %v2730_v30 = vunpack.i.l.bf16 %v2729_v19 }
 0x196   :  { %v1443_v47 = vsel %vm1439_vm10, %v1417_v17, %v2726_v9  ;;  %v1442_v37 = vsel %vm1439_vm10, %v1416_v48, %v2725_v24  ;;  %v2736_v44 = vunpack.i.h.bf16 %v2734_v11  ;;  %v2735_v14 = vunpack.i.l.bf16 %v2734_v11  ;;  %3018 = vrot.lane.b32.xlu0 %v3017_v51, %s3120_s13  ;;  %v2739_v33 = vpop.permute.xlu1 %2738  ;;  %v2744_v60 = vpop.permute.xlu0 %2743 }
 0x197   :  { %v1467_v58 = vsel %vm131_vm0, %v1442_v37, %v2730_v30  ;;  %v1468_v0 = vsel %vm131_vm0, %v1443_v47, %v2731_v1  ;;  %v3027_v62 = vpack.i.bf16 %v973_v18, %v3971_v25  ;;  %v644_v55 = vrot.slane %v4020_v8, 2 }
 0x198   :  { %v1303_v45 = vsel %vm1260_vm5, %v1300_v54, %v1302_v32  ;;  %v5369_v63 = vrot.slane %v4020_v8, 6  ;;  %v515_v53 = vrot.slane %v4396_v22, 1  ;;  %v517_v36 = vrot.slane %v4020_v8, 1 }
 0x199   :  { %3023 = vrot.lane.b32.xlu1 %v3022_v16, %s3122_s15  ;;  %v2741_v10 = vunpack.i.h.bf16 %v2739_v33  ;;  %v2740_v21 = vunpack.i.l.bf16 %v2739_v33  ;;  %v1176_v25 = vsel %vm1133_vm6, %v1173_v34, %v1175_v20  ;;  %v5370_v18 = vrot.slane %v4020_v8, 5 }
 0x19a   :  { %v1305_v7 = vsel %vm1260_vm5, %v1302_v32, %v5369_v63  ;;  %v1493_v54 = vsel %vm1490_vm11, %v1467_v58, %v2735_v14  ;;  %v1494_v24 = vsel %vm1490_vm11, %v1468_v0, %v2736_v44  ;;  %v2746_v61 = vunpack.i.h.bf16 %v2744_v60  ;;  %3028 = vrot.lane.b32.xlu0 %v3027_v62, %s3125_s4  ;;  %v2749_v32 = vpop.permute.xlu1 %2748  ;;  %v2754_v1 = vpop.permute.xlu0 %2753 }
 0x19b   :  { %v1178_v9 = vsel %vm1133_vm6, %v1175_v20, %v5370_v18  ;;  %v2745_v16 = vunpack.i.l.bf16 %v2744_v60  ;;  %v1519_v19 = vsel %vm1516_vm12, %v1493_v54, %v2740_v21  ;;  %v1520_v51 = vsel %vm1516_vm12, %v1494_v24, %v2741_v10 }
 0x19c   :  { %v3042_v34 = vpack.i.bf16 %v1305_v7, %v1303_v45  ;;  %v847_v48 = vrot.slane %v4020_v8, 3  ;;  %v2751_v17 = vunpack.i.h.bf16 %v2749_v32  ;;  %v2750_v20 = vunpack.i.l.bf16 %v2749_v32 }
 0x19d   :  { %3033 = vrot.lane.b32.xlu1 %v3032_v56, %s3124_s19  ;;  %v3037_v30 = vpack.i.bf16 %v1178_v9, %v1176_v25  ;;  %v645_v11 = vsel %vm596_vm1, %v642_v46, %v644_v55  ;;  %v1545_v56 = vsel %vm1542_vm13, %v1519_v19, %v2745_v16  ;;  %v1546_v47 = vsel %vm1542_vm13, %v1520_v51, %v2746_v61 }
 0x19e   :  { %v516_v37 = vsel %vm469_vm2, %v513_v52, %v515_v53  ;;  %v518_v44 = vsel %vm469_vm2, %v515_v53, %v517_v36  ;;  %v1571_v14 = vsel %vm1568_vm14, %v1545_v56, %v2750_v20  ;;  %v1572_v58 = vsel %vm1568_vm14, %v1546_v47, %v2751_v17  ;;  %v2759_v0 = vpop.permute.xlu1 %2758  ;;  %v2764_v33 = vpop.permute.xlu0 %2763 }
 0x19f   :  { %3038 = vrot.lane.b32.xlu0 %v3037_v30, %s3127_s22  ;;  %v1595_v46 = vpack.c.bf16 %v1572_v58, %v1571_v14  ;;  %v3052_v62 = vpack.i.bf16 %v645_v11, %v4449_v27  ;;  %v3047_v45 = vpack.i.bf16 %v518_v44, %v516_v37  ;;  %v848_v52 = vsel %vm801_vm3, %v845_v4, %v847_v48 }
 0x1a0   :  { %v5371_v63 = vrot.slane %v4030_v15, 3  ;;  %v5372_v53 = vrot.slane %v4030_v15, 2  ;;  %v2756_v27 = vunpack.i.h.bf16 %v2754_v1  ;;  %v2755_v21 = vunpack.i.l.bf16 %v2754_v1 }
 0x1a1   :  { %3043 = vrot.lane.b32.xlu1 %v3042_v34, %s3126_s21  ;;  %2492 = vmatmul.mubr.msk.bf16.gmra.mrb[16].mxu1 %vm1643_vm15, %v1595_v46  ;;  %v2761_v9 = vunpack.i.h.bf16 %v2759_v0  ;;  %v2760_v54 = vunpack.i.l.bf16 %v2759_v0  ;;  %v3067_v16 = vpack.i.bf16 %v4098_v43, %v4461_v35  ;;  %v2766_v19 = vunpack.i.h.bf16 %v2764_v33 }
 0x1a2   :  { %v850_v7 = vsel %vm801_vm3, %v847_v48, %v5371_v63  ;;  %v647_v10 = vsel %vm596_vm1, %v644_v55, %v5372_v53  ;;  %2495 = vmatprep.mubr.msk.bf16.mxu1 %vm3129_vm7, %v5362_v59  ;;  %v2769_v4 = vpop.permute.xlu1 %2768  ;;  %v2774_v25 = vpop.permute.xlu0 %2773  ;;  %v1393_v55 = vsel %vm1387_vm8, %v3631_v39, %v2756_v27  ;;  %v1392_v24 = vsel %vm1387_vm8, %v3511_v41, %v2755_v21 }
 0x1a3   :  { %3048 = vrot.lane.b32.xlu0 %v3047_v45, %s3121_s14  ;;  %v3062_v60 = vpack.i.bf16 %v850_v7, %v848_v52  ;;  %v3057_v18 = vpack.i.bf16 %v647_v10, %v645_v11  ;;  %v2765_v51 = vunpack.i.l.bf16 %v2764_v33  ;;  %v1418_v17 = vsel %vm1413_vm9, %v1392_v24, %v2760_v54 }
 0x1a4   :  { %v1419_v20 = vsel %vm1413_vm9, %v1393_v55, %v2761_v9  ;;  %v5373_v39 = vpack.i.bf16 %v4101_v6, %v4098_v43  ;;  %v2771_v41 = vunpack.i.h.bf16 %v2769_v4  ;;  %v2770_v11 = vunpack.i.l.bf16 %v2769_v4 }
 0x1a5   :  { %3053 = vrot.lane.b32.xlu1 %v3052_v62, %s3123_s16  ;;  %v519_v37 = vrot.slane %v4030_v15, 1  ;;  %v1444_v44 = vsel %vm1439_vm10, %v1418_v17, %v2765_v51  ;;  %v1445_v14 = vsel %vm1439_vm10, %v1419_v20, %v2766_v19  ;;  %v2776_v0 = vunpack.i.h.bf16 %v2774_v25  ;;  %v5377_v20 = vld [vmem:[#allocation9_spill] sm:$0xff] }
 0x1a6   :  { %v2784_v61 = vpop.permute.xlu1 %2783  ;;  %v2779_v48 = vpop.permute.xlu0 %2778  ;;  %v2775_v62 = vunpack.i.l.bf16 %v2774_v25  ;;  %v1469_v15 = vsel %vm131_vm0, %v1444_v44, %v2770_v11  ;;  %v5375_v7 = vpack.i.bf16 %v4129_v31, %v4120_v13 }
 0x1a7   :  { %3058 = vrot.lane.b32.xlu0 %v3057_v18, %s3120_s13  ;;  %v2786_v32 = vunpack.i.h.bf16 %v2784_v61  ;;  %v2785_v34 = vunpack.i.l.bf16 %v2784_v61  ;;  %v2781_v1 = vunpack.i.h.bf16 %v2779_v48  ;;  %v2780_v30 = vunpack.i.l.bf16 %v2779_v48 }
 0x1a8   :  { %v1495_v25 = vsel %vm1490_vm11, %v1469_v15, %v2775_v62  ;;  %v5381_v15 = vld [vmem:[#allocation11_spill] sm:$0xff] }
 0x1a9   :  { %3063 = vrot.lane.b32.xlu1 %v3062_v60, %s3122_s15  ;;  %v1459_v35 = vsel %vm1439_vm10, %v4479_v28, %v2781_v1  ;;  %v1458_v56 = vsel %vm1439_vm10, %v4476_v29, %v2780_v30  ;;  %v5374_v29 = vpack.i.bf16 %v4112_v2, %v4109_v50  ;;  %v1470_v28 = vsel %vm131_vm0, %v1445_v14, %v2771_v41  ;;  %v5378_v1 = vld [vmem:[#allocation3_spill] sm:$0xff] }
 0x1aa   :  { %v2794_v47 = vpop.permute.xlu1 %2793  ;;  %v2789_v58 = vpop.permute.xlu0 %2788  ;;  %v1483_v43 = vsel %vm131_vm0, %v1458_v56, %v2785_v34  ;;  %v1484_v46 = vsel %vm131_vm0, %v1459_v35, %v2786_v32  ;;  %v520_v60 = vsel %vm469_vm2, %v517_v36, %v519_v37  ;;  %v1496_v18 = vsel %vm1490_vm11, %v1470_v28, %v2776_v0  ;;  %v5380_v37 = vld [vmem:[#allocation10_spill] sm:$0xff] }
 0x1ab   :  { %3068 = vrot.lane.b32.xlu0 %v3067_v16, %s3125_s4  ;;  %v2791_v33 = vunpack.i.h.bf16 %v2789_v58  ;;  %v2790_v45 = vunpack.i.l.bf16 %v2789_v58  ;;  %v2796_v52 = vunpack.i.h.bf16 %v2794_v47  ;;  %v2795_v63 = vunpack.i.l.bf16 %v2794_v47 }
 0x1ad   :  { %3073 = vrot.lane.b32.xlu1 %v5373_v39, %s3124_s19  ;;  %v4583_v53 = vsel %vm1490_vm11, %v1483_v43, %v2790_v45  ;;  %v4586_v27 = vsel %vm1490_vm11, %v1484_v46, %v2791_v33  ;;  %v1522_v9 = vsel %vm1516_vm12, %v1496_v18, %v2796_v52  ;;  %v1521_v54 = vsel %vm1516_vm12, %v1495_v25, %v2795_v63  ;;  %v5379_v39 = vld [vmem:[#allocation2_spill] sm:$0xff] }
 0x1ae   :  { %v2804_v21 = vpop.permute.xlu1 %2803  ;;  %v2799_v50 = vpop.permute.xlu0 %2798 }
 0x1af   :  { %3078 = vrot.lane.b32.xlu0 %v5375_v7, %s3127_s22  ;;  %v2806_v2 = vunpack.i.h.bf16 %v2804_v21  ;;  %v2805_v4 = vunpack.i.l.bf16 %v2804_v21  ;;  %v2801_v31 = vunpack.i.h.bf16 %v2799_v50  ;;  %v2800_v13 = vunpack.i.l.bf16 %v2799_v50  ;;  %v5382_v21 = vld [vmem:[#allocation12_spill] sm:$0xff] }
 0x1b1   :  { %3083 = vrot.lane.b32.xlu1 %v5374_v29, %s3126_s21  ;;  %v1547_v55 = vsel %vm1542_vm13, %v1521_v54, %v2800_v13  ;;  %v1548_v24 = vsel %vm1542_vm13, %v1522_v9, %v2801_v31 }
 0x1b2   :  { %v2814_v61 = vpop.permute.xlu1 %2813  ;;  %v1573_v36 = vsel %vm1568_vm14, %v1547_v55, %v2805_v4  ;;  %v1574_v16 = vsel %vm1568_vm14, %v1548_v24, %v2806_v2  ;;  %v2809_v19 = vpop.permute.xlu0 %2808 }
 0x1b3   :  { %569 = vrot.lane.b32.xlu0 %v520_v60, %s3121_s14  ;;  %v1596_v51 = vpack.c.bf16 %v1574_v16, %v1573_v36  ;;  %v2811_v32 = vunpack.i.h.bf16 %v2809_v19  ;;  %v2810_v34 = vunpack.i.l.bf16 %v2809_v19  ;;  %v2816_v48 = vunpack.i.h.bf16 %v2814_v61 }
 0x1b4   :  { %v2815_v17 = vunpack.i.l.bf16 %v2814_v61 }
 0x1b5   :  { %696 = vrot.lane.b32.xlu1 %v647_v10, %s3123_s16  ;;  %v5376_v10 = vld [vmem:[#allocation8_spill] sm:$0xff]  ;;  %v1395_v30 = vsel %vm1387_vm8, %v5378_v1, %v2811_v32  ;;  %v1394_v41 = vsel %vm1387_vm8, %v5379_v39, %v2810_v34  ;;  %2496 = vmatmul.mubr.msk.bf16.gmra.mrb[20].mxu1 %vm1643_vm15, %v1596_v51 }
 0x1b6   :  { %v2824_v11 = vpop.permute.xlu1 %2823  ;;  %v2819_v35 = vpop.permute.xlu0 %2818  ;;  %2499 = vmatprep.mubr.msk.bf16.mxu1 %vm3129_vm7, %v5362_v59  ;;  %v1420_v58 = vsel %vm1413_vm9, %v1394_v41, %v2815_v17  ;;  %v1421_v43 = vsel %vm1413_vm9, %v1395_v30, %v2816_v48  ;;  %v5383_v48 = vld [vmem:[#allocation5_spill] sm:$0xff] }
 0x1b7   :  { %774 = vrot.lane.b32.xlu0 %v5377_v20, %s3120_s13  ;;  %v2821_v56 = vunpack.i.h.bf16 %v2819_v35  ;;  %v2820_v47 = vunpack.i.l.bf16 %v2819_v35  ;;  %v2826_v44 = vunpack.i.h.bf16 %v2824_v11  ;;  %v2825_v14 = vunpack.i.l.bf16 %v2824_v11  ;;  %v5384_v20 = vld [vmem:[#allocation4_spill] sm:$0xff] }
 0x1b9   :  { %901 = vrot.lane.b32.xlu1 %v5376_v10, %s3122_s15  ;;  %v1447_v46 = vsel %vm1439_vm10, %v1421_v43, %v2821_v56  ;;  %v1446_v0 = vsel %vm1439_vm10, %v1420_v58, %v2820_v47 }
 0x1ba   :  { %v2834_v62 = vpop.permute.xlu1 %2833  ;;  %v2829_v33 = vpop.permute.xlu0 %2828  ;;  %v1471_v63 = vsel %vm131_vm0, %v1446_v0, %v2825_v14  ;;  %v1472_v7 = vsel %vm131_vm0, %v1447_v46, %v2826_v44 }
 0x1bb   :  { %1028 = vrot.lane.b32.xlu0 %v4101_v6, %s3125_s4  ;;  %v2831_v45 = vunpack.i.h.bf16 %v2829_v33  ;;  %v2830_v29 = vunpack.i.l.bf16 %v2829_v33  ;;  %v2836_v28 = vunpack.i.h.bf16 %v2834_v62  ;;  %v2835_v52 = vunpack.i.l.bf16 %v2834_v62 }
 0x1bd   :  { %1106 = vrot.lane.b32.xlu1 %v5380_v37, %s3124_s19  ;;  %v1497_v6 = vsel %vm1490_vm11, %v1471_v63, %v2830_v29  ;;  %v1498_v50 = vsel %vm1490_vm11, %v1472_v7, %v2831_v45 }
 0x1be   :  { %v2844_v2 = vpop.permute.xlu1 %2843  ;;  %v2839_v25 = vpop.permute.xlu0 %2838  ;;  %v1523_v13 = vsel %vm1516_vm12, %v1497_v6, %v2835_v52  ;;  %v1524_v9 = vsel %vm1516_vm12, %v1498_v50, %v2836_v28 }
 0x1bf   :  { %1233 = vrot.lane.b32.xlu0 %v5382_v21, %s3127_s22  ;;  %v2846_v4 = vunpack.i.h.bf16 %v2844_v2  ;;  %v2845_v60 = vunpack.i.l.bf16 %v2844_v2  ;;  %v2841_v18 = vunpack.i.h.bf16 %v2839_v25  ;;  %v2840_v31 = vunpack.i.l.bf16 %v2839_v25 }
 0x1c1   :  { %1360 = vrot.lane.b32.xlu1 %v5381_v15, %s3126_s21  ;;  %v1549_v54 = vsel %vm1542_vm13, %v1523_v13, %v2840_v31  ;;  %v1550_v55 = vsel %vm1542_vm13, %v1524_v9, %v2841_v18 }
 0x1c2   :  { %v2854_v24 = vpop.permute.xlu1 %2853  ;;  %v2849_v61 = vpop.permute.xlu0 %2848  ;;  %v1575_v36 = vsel %vm1568_vm14, %v1549_v54, %v2845_v60  ;;  %v1576_v16 = vsel %vm1568_vm14, %v1550_v55, %v2846_v4 }
 0x1c3   :  { %v2851_v19 = vunpack.i.h.bf16 %v2849_v61  ;;  %v2850_v51 = vunpack.i.l.bf16 %v2849_v61  ;;  %v1597_v32 = vpack.c.bf16 %v1576_v16, %v1575_v36  ;;  %v2856_v34 = vunpack.i.h.bf16 %v2854_v24 }
 0x1c4   :  { %v2855_v10 = vunpack.i.l.bf16 %v2854_v24 }
 0x1c5   :  { %v1397_v17 = vsel %vm1387_vm8, %v5383_v48, %v2851_v19  ;;  %v1396_v1 = vsel %vm1387_vm8, %v5384_v20, %v2850_v51  ;;  %2500 = vmatmul.mubr.msk.bf16.gmra.mrb[24].mxu1 %vm1643_vm15, %v1597_v32 }
 0x1c6   :  { %v2864_v30 = vpop.permute.xlu1 %2863  ;;  %v2859_v39 = vpop.permute.xlu0 %2858  ;;  %2503 = vmatprep.mubr.msk.bf16.mxu1 %vm3129_vm7, %v5362_v59  ;;  %v1422_v47 = vsel %vm1413_vm9, %v1396_v1, %v2855_v10  ;;  %v1423_v37 = vsel %vm1413_vm9, %v1397_v17, %v2856_v34 }
 0x1c7   :  { %v2861_v41 = vunpack.i.h.bf16 %v2859_v39  ;;  %v2860_v11 = vunpack.i.l.bf16 %v2859_v39  ;;  %v2866_v35 = vunpack.i.h.bf16 %v2864_v30  ;;  %v2865_v56 = vunpack.i.l.bf16 %v2864_v30 }
 0x1c9   :  { %v1448_v44 = vsel %vm1439_vm10, %v1422_v47, %v2860_v11  ;;  %v1449_v14 = vsel %vm1439_vm10, %v1423_v37, %v2861_v41  ;;  %v5385_v41 = vld [vmem:[#allocation13_spill] sm:$0xff] }
 0x1ca   :  { %v2874_v58 = vpop.permute.xlu1 %2873  ;;  %v2869_v43 = vpop.permute.xlu0 %2868  ;;  %v1473_v62 = vsel %vm131_vm0, %v1448_v44, %v2865_v56  ;;  %v1474_v33 = vsel %vm131_vm0, %v1449_v14, %v2866_v35  ;;  %v2636_v11 = vunpack.i.h.bf16 %v5385_v41  ;;  %v2635_v47 = vunpack.i.l.bf16 %v5385_v41  ;;  %v5386_v14 = vld [vmem:[#allocation7_spill] sm:$0xff] }
 0x1cb   :  { %v2871_v46 = vunpack.i.h.bf16 %v2869_v43  ;;  %v2870_v0 = vunpack.i.l.bf16 %v2869_v43  ;;  %v2876_v45 = vunpack.i.h.bf16 %v2874_v58  ;;  %v2875_v29 = vunpack.i.l.bf16 %v2874_v58 }
 0x1cd   :  { %v1499_v15 = vsel %vm1490_vm11, %v1473_v62, %v2870_v0  ;;  %v1500_v28 = vsel %vm1490_vm11, %v1474_v33, %v2871_v46 }
 0x1ce   :  { %v2884_v52 = vpop.permute.xlu1 %2883  ;;  %v2879_v63 = vpop.permute.xlu0 %2878  ;;  %v1526_v2 = vsel %vm1516_vm12, %v1500_v28, %v2876_v45  ;;  %v1525_v4 = vsel %vm1516_vm12, %v1499_v15, %v2875_v29  ;;  %v1922_v45 = vld [vmem:[%s5271_s8] sm:$0xf] }
 0x1cf   :  { %v2886_v7 = vunpack.i.h.bf16 %v2884_v52  ;;  %v2885_v21 = vunpack.i.l.bf16 %v2884_v52  ;;  %v2881_v6 = vunpack.i.h.bf16 %v2879_v63  ;;  %v2880_v50 = vunpack.i.l.bf16 %v2879_v63  ;;  %v5388_v63 = vld [vmem:[#allocation14_spill] sm:$0xff] }
 0x1d0   :  { %v1963_v52 = vsel %vm928_vm4, %v1922_v45, 0 }
 0x1d1   :  { %v1551_v60 = vsel %vm1542_vm13, %v1525_v4, %v2880_v50  ;;  %v1552_v25 = vsel %vm1542_vm13, %v1526_v2, %v2881_v6  ;;  %2540 = vmatpush3.bf16.msra.mxu0 %v1963_v52  ;;  %v5389_v2 = vld [vmem:[#allocation15_spill] sm:$0xff] }
 0x1d2   :  { %v2894_v18 = vpop.permute.xlu1 %2893  ;;  %v1577_v31 = vsel %vm1568_vm14, %v1551_v60, %v2885_v21  ;;  %v1578_v13 = vsel %vm1568_vm14, %v1552_v25, %v2886_v7  ;;  %v2889_v9 = vpop.permute.xlu0 %2888  ;;  %v2646_v7 = vunpack.i.h.bf16 %v5388_v63  ;;  %v2645_v21 = vunpack.i.l.bf16 %v5388_v63 }
 0x1d3   :  { %v1598_v54 = vpack.c.bf16 %v1578_v13, %v1577_v31  ;;  %v2891_v51 = vunpack.i.h.bf16 %v2889_v9  ;;  %v2890_v34 = vunpack.i.l.bf16 %v2889_v9  ;;  %v2896_v37 = vunpack.i.h.bf16 %v2894_v18 }
 0x1d4   :  { %v2895_v44 = vunpack.i.l.bf16 %v2894_v18  ;;  %v2641_v4 = vunpack.i.h.bf16 %v5389_v2  ;;  %v2640_v60 = vunpack.i.l.bf16 %v5389_v2 }
 0x1d5   :  { %2504 = vmatmul.mubr.msk.bf16.gmra.mrb[28].mxu1 %vm1643_vm15, %v1598_v54  ;;  %v1399_v58 = vsel %vm1387_vm8, %v5386_v14, %v2891_v51 }
 0x1d6   :  { %v4656_v55 = vpop.permute.xlu1 %2898  ;;  %v4658_v24 = vpop.permute.xlu0 %2903  ;;  %2507 = vmatprep.mubr.msk.bf16.mxu1 %vm3129_vm7, %v5362_v59 }
 0x1da   :  { %v4662_v61 = vpop.permute.xlu1 %2908  ;;  %v2914_v36 = vpop.permute.xlu0 %2913 }
 0x1db   :  { %v2916_v16 = vunpack.i.h.bf16 %v2914_v36  ;;  %v2915_v19 = vunpack.i.l.bf16 %v2914_v36  ;;  %v1425_v36 = vsel %vm1413_vm9, %v1399_v58, %v2896_v37 }
 0x1dd   :  { %v1403_v20 = vsel %vm1387_vm8, %v3821_v42, %v2916_v16  ;;  %v1402_v1 = vsel %vm1387_vm8, %v4060_v38, %v2915_v19  ;;  %v5387_v42 = vld [vmem:[#allocation6_spill] sm:$0xff] }
 0x1de   :  { %v2919_v32 = vpop.permute.xlu1 %2918  ;;  %v2924_v17 = vpop.permute.xlu0 %2923  ;;  %v1398_v46 = vsel %vm1387_vm8, %v5387_v42, %v2890_v34 }
 0x1df   :  { %v2921_v10 = vunpack.i.h.bf16 %v2919_v32  ;;  %v2920_v48 = vunpack.i.l.bf16 %v2919_v32  ;;  %v2926_v30 = vunpack.i.h.bf16 %v2924_v17  ;;  %v2925_v39 = vunpack.i.l.bf16 %v2924_v17 }
 0x1e0   :  { %v1424_v54 = vsel %vm1413_vm9, %v1398_v46, %v2895_v44 }
 0x1e1   :  { %v1428_v35 = vsel %vm1413_vm9, %v1402_v1, %v2920_v48  ;;  %v1429_v56 = vsel %vm1413_vm9, %v1403_v20, %v2921_v10 }
 0x1e2   :  { %v1454_v38 = vsel %vm1439_vm10, %v1428_v35, %v2925_v39  ;;  %v2934_v33 = vpop.permute.xlu0 %2933  ;;  %v1455_v29 = vsel %vm1439_vm10, %v1429_v56, %v2926_v30 }
 0x1e3   :  { %v2936_v15 = vunpack.i.h.bf16 %v2934_v33  ;;  %v2935_v28 = vunpack.i.l.bf16 %v2934_v33 }
 0x1e4   :  { %v2929_v43 = vpop.permute.xlu1 %2928 }
 0x1e5   :  { %v2931_v0 = vunpack.i.h.bf16 %v2929_v43  ;;  %v2930_v62 = vunpack.i.l.bf16 %v2929_v43 }
 0x1e6   :  { %v2939_v16 = vpop.permute.xlu0 %2938 }
 0x1e7   :  { %v1479_v6 = vsel %vm131_vm0, %v1454_v38, %v2930_v62  ;;  %v1480_v50 = vsel %vm131_vm0, %v1455_v29, %v2931_v0  ;;  %v2941_v19 = vunpack.i.h.bf16 %v2939_v16  ;;  %v2940_v51 = vunpack.i.l.bf16 %v2939_v16 }
 0x1e8   :  { %v1505_v25 = vsel %vm1490_vm11, %v1479_v6, %v2935_v28  ;;  %v1506_v18 = vsel %vm1490_vm11, %v1480_v50, %v2936_v15  ;;  %v2944_v31 = vpop.permute.xlu1 %2943 }
 0x1e9   :  { %v1531_v13 = vsel %vm1516_vm12, %v1505_v25, %v2635_v47  ;;  %v1532_v9 = vsel %vm1516_vm12, %v1506_v18, %v2636_v11  ;;  %v2946_v10 = vunpack.i.h.bf16 %v2944_v31  ;;  %v2945_v48 = vunpack.i.l.bf16 %v2944_v31 }
 0x1ea   :  { %v1557_v32 = vsel %vm1542_vm13, %v1531_v13, %v2640_v60  ;;  %v1558_v34 = vsel %vm1542_vm13, %v1532_v9, %v2641_v4  ;;  %v1451_v1 = vsel %vm1439_vm10, %v1425_v36, %v2941_v19  ;;  %v1450_v30 = vsel %vm1439_vm10, %v1424_v54, %v2940_v51  ;;  %v2949_v11 = vpop.permute.xlu0 %2948 }
 0x1eb   :  { %v4697_v17 = vsel %vm1568_vm14, %v1557_v32, %v2645_v21  ;;  %v4700_v20 = vsel %vm1568_vm14, %v1558_v34, %v2646_v7  ;;  %v2951_v35 = vunpack.i.h.bf16 %v2949_v11  ;;  %v2950_v56 = vunpack.i.l.bf16 %v2949_v11 }
 0x1ec   :  { %v2954_v39 = vpop.permute.xlu1 %2953  ;;  %v1601_v41 = vpack.c.bf16 %v4700_v20, %v4697_v17  ;;  %v1475_v44 = vsel %vm131_vm0, %v1450_v30, %v2945_v48  ;;  %v1476_v14 = vsel %vm131_vm0, %v1451_v1, %v2946_v10  ;;  %v2901_v34 = vunpack.i.h.bf16 %v4656_v55 }
 0x1ed   :  { %v2956_v47 = vunpack.i.h.bf16 %v2954_v39  ;;  %v2955_v37 = vunpack.i.l.bf16 %v2954_v39  ;;  %v1501_v58 = vsel %vm1490_vm11, %v1475_v44, %v2950_v56  ;;  %v1502_v43 = vsel %vm1490_vm11, %v1476_v14, %v2951_v35 }
 0x1ee   :  { %v2959_v0 = vpop.permute.xlu0 %2958  ;;  %v2900_v10 = vunpack.i.l.bf16 %v4656_v55  ;;  %v2906_v1 = vunpack.i.h.bf16 %v4658_v24  ;;  %v2905_v30 = vunpack.i.l.bf16 %v4658_v24  ;;  %v2911_v44 = vunpack.i.h.bf16 %v4662_v61 }
 0x1ef   :  { %v2961_v62 = vunpack.i.h.bf16 %v2959_v0  ;;  %v2960_v33 = vunpack.i.l.bf16 %v2959_v0  ;;  %v1527_v45 = vsel %vm1516_vm12, %v1501_v58, %v2955_v37  ;;  %v1528_v29 = vsel %vm1516_vm12, %v1502_v43, %v2956_v47 }
 0x1f0   :  { %v2964_v42 = vpop.permute.xlu1 %2963  ;;  %v2910_v14 = vunpack.i.l.bf16 %v4662_v61 }
 0x1f1   :  { %v2966_v46 = vunpack.i.h.bf16 %v2964_v42  ;;  %v2965_v38 = vunpack.i.l.bf16 %v2964_v42  ;;  %v1553_v15 = vsel %vm1542_vm13, %v1527_v45, %v2960_v33  ;;  %v1554_v28 = vsel %vm1542_vm13, %v1528_v29, %v2961_v62 }
 0x1f2   :  { %v2969_v63 = vpop.permute.xlu0 %2968 }
 0x1f3   :  { %v1579_v7 = vsel %vm1568_vm14, %v1553_v15, %v2965_v38  ;;  %v1580_v21 = vsel %vm1568_vm14, %v1554_v28, %v2966_v46  ;;  %v2971_v6 = vunpack.i.h.bf16 %v2969_v63  ;;  %v2970_v50 = vunpack.i.l.bf16 %v2969_v63 }
 0x1f4   :  { %v2974_v52 = vpop.permute.xlu1 %2973  ;;  %v1599_v2 = vpack.c.bf16 %v1580_v21, %v1579_v7 }
 0x1f5   :  { %v2976_v4 = vunpack.i.h.bf16 %v2974_v52  ;;  %v2975_v60 = vunpack.i.l.bf16 %v2974_v52  ;;  %v1401_v25 = vsel %vm1387_vm8, %v4201_v3, %v2971_v6  ;;  %v1400_v18 = vsel %vm1387_vm8, %v3924_v40, %v2970_v50 }
 0x1f6   :  { %2508 = vmatmul.mubr.msk.bf16.gmra.mrb[32].mxu1 %vm1643_vm15, %v1599_v2  ;;  %v2979_v13 = vpop.permute.xlu0 %2978 }
 0x1f7   :  { %2511 = vmatprep.mubr.msk.bf16.mxu1 %vm3129_vm7, %v5362_v59  ;;  %v2981_v9 = vunpack.i.h.bf16 %v2979_v13  ;;  %v2980_v54 = vunpack.i.l.bf16 %v2979_v13  ;;  %v1426_v19 = vsel %vm1413_vm9, %v1400_v18, %v2975_v60  ;;  %v1427_v51 = vsel %vm1413_vm9, %v1401_v25, %v2976_v4 }
 0x1f8   :  { %v2984_v31 = vpop.permute.xlu1 %2983 }
 0x1f9   :  { %v2986_v36 = vunpack.i.h.bf16 %v2984_v31  ;;  %v2985_v16 = vunpack.i.l.bf16 %v2984_v31  ;;  %v1452_v3 = vsel %vm1439_vm10, %v1426_v19, %v2980_v54  ;;  %v1453_v32 = vsel %vm1439_vm10, %v1427_v51, %v2981_v9 }
 0x1fa   :  { %v2994_v48 = vpop.permute.xlu0 %2993 }
 0x1fb   :  { %v2996_v39 = vunpack.i.h.bf16 %v2994_v48  ;;  %v2995_v11 = vunpack.i.l.bf16 %v2994_v48  ;;  %v1477_v47 = vsel %vm131_vm0, %v1452_v3, %v2985_v16  ;;  %v1478_v37 = vsel %vm131_vm0, %v1453_v32, %v2986_v36 }
 0x1fd   :  { %v2989_v40 = vpop.permute.xlu1 %2988  ;;  %v1503_v58 = vsel %vm1490_vm11, %v1477_v47, %v2995_v11  ;;  %v1504_v55 = vsel %vm1490_vm11, %v1478_v37, %v2996_v39 }
 0x1fe   :  { %v2991_v35 = vunpack.i.h.bf16 %v2989_v40  ;;  %v2990_v56 = vunpack.i.l.bf16 %v2989_v40  ;;  %v1529_v42 = vsel %vm1516_vm12, %v1503_v58, %v2900_v10  ;;  %v1530_v24 = vsel %vm1516_vm12, %v1504_v55, %v2901_v34 }
 0x1ff   :  { %v2999_v0 = vpop.permute.xlu0 %2998  ;;  %v1555_v45 = vsel %vm1542_vm13, %v1529_v42, %v2905_v30  ;;  %v1556_v29 = vsel %vm1542_vm13, %v1530_v24, %v2906_v1 }
 0x200   :  { %v3001_v62 = vunpack.i.h.bf16 %v2999_v0  ;;  %v3000_v33 = vunpack.i.l.bf16 %v2999_v0  ;;  %v1536_v61 = vsel %vm1516_vm12, %v4586_v27, %v2991_v35  ;;  %v1535_v15 = vsel %vm1516_vm12, %v4583_v53, %v2990_v56 }
 0x201   :  { %v3004_v43 = vpop.permute.xlu1 %3003  ;;  %v1581_v28 = vsel %vm1568_vm14, %v1555_v45, %v2910_v14  ;;  %v1582_v52 = vsel %vm1568_vm14, %v1556_v29, %v2911_v44 }
 0x202   :  { %v3006_v46 = vunpack.i.h.bf16 %v3004_v43  ;;  %v3005_v38 = vunpack.i.l.bf16 %v3004_v43  ;;  %v1562_v63 = vsel %vm1542_vm13, %v1536_v61, %v3001_v62  ;;  %v1561_v7 = vsel %vm1542_vm13, %v1535_v15, %v3000_v33 }
 0x203   :  { %v1600_v6 = vpack.c.bf16 %v1582_v52, %v1581_v28  ;;  %v3009_v50 = vpop.permute.xlu0 %3008 }
 0x204   :  { %v4750_v2 = vsel %vm1568_vm14, %v1561_v7, %v3005_v38  ;;  %v4753_v4 = vsel %vm1568_vm14, %v1562_v63, %v3006_v46  ;;  %v3011_v25 = vunpack.i.h.bf16 %v3009_v50  ;;  %v3010_v18 = vunpack.i.l.bf16 %v3009_v50 }
 0x205   :  { %2512 = vmatmul.mubr.msk.bf16.gmra.mrb[36].mxu1 %vm1643_vm15, %v1600_v6  ;;  %v1603_v53 = vpack.c.bf16 %v4753_v4, %v4750_v2 }
 0x206   :  { %2515 = vmatprep.mubr.msk.bf16.mxu1 %vm3129_vm7, %v5362_v59  ;;  %v1409_v36 = vsel %vm1387_vm8, %v3748_v26, %v3011_v25  ;;  %v1408_v16 = vsel %vm1387_vm8, %v3596_v12, %v3010_v18 }
 0x207   :  { %v3014_v21 = vpop.permute.xlu1 %3013 }
 0x208   :  { %v3019_v60 = vpop.permute.xlu0 %3018  ;;  %v3016_v9 = vunpack.i.h.bf16 %v3014_v21  ;;  %v3015_v54 = vunpack.i.l.bf16 %v3014_v21 }
 0x209   :  { %v3021_v19 = vunpack.i.h.bf16 %v3019_v60  ;;  %v3020_v51 = vunpack.i.l.bf16 %v3019_v60 }
 0x20a   :  { %v1434_v17 = vsel %vm1413_vm9, %v1408_v16, %v3015_v54  ;;  %v1435_v20 = vsel %vm1413_vm9, %v1409_v36, %v3016_v9 }
 0x20b   :  { %v3024_v27 = vpop.permute.xlu1 %3023  ;;  %v1461_v10 = vsel %vm1439_vm10, %v1435_v20, %v3021_v19 }
 0x20c   :  { %v3029_v13 = vpop.permute.xlu0 %3028  ;;  %v3026_v40 = vunpack.i.h.bf16 %v3024_v27  ;;  %v3025_v34 = vunpack.i.l.bf16 %v3024_v27 }
 0x20d   :  { %2516 = vmatmul.mubr.msk.bf16.gmra.mrb[40].mxu1 %vm1643_vm15, %v1601_v41  ;;  %v1460_v41 = vsel %vm1439_vm10, %v1434_v17, %v3020_v51  ;;  %v3031_v48 = vunpack.i.h.bf16 %v3029_v13  ;;  %v3030_v1 = vunpack.i.l.bf16 %v3029_v13 }
 0x20e   :  { %2519 = vmatprep.mubr.msk.bf16.mxu1 %vm3129_vm7, %v5362_v59  ;;  %v1485_v56 = vsel %vm131_vm0, %v1460_v41, %v3025_v34  ;;  %v1486_v47 = vsel %vm131_vm0, %v1461_v10, %v3026_v40 }
 0x20f   :  { %v3034_v31 = vpop.permute.xlu1 %3033  ;;  %v1511_v37 = vsel %vm1490_vm11, %v1485_v56, %v3030_v1  ;;  %v1512_v44 = vsel %vm1490_vm11, %v1486_v47, %v3031_v48 }
 0x210   :  { %v3036_v11 = vunpack.i.h.bf16 %v3034_v31  ;;  %v3035_v35 = vunpack.i.l.bf16 %v3034_v31 }
 0x211   :  { %v3039_v32 = vpop.permute.xlu0 %3038 }
 0x212   :  { %v3041_v14 = vunpack.i.h.bf16 %v3039_v32  ;;  %v3040_v58 = vunpack.i.l.bf16 %v3039_v32  ;;  %v1537_v38 = vsel %vm1516_vm12, %v1511_v37, %v3035_v35  ;;  %v1538_v0 = vsel %vm1516_vm12, %v1512_v44, %v3036_v11 }
 0x213   :  { %v3044_v3 = vpop.permute.xlu1 %3043 }
 0x214   :  { %v3046_v62 = vunpack.i.h.bf16 %v3044_v3  ;;  %v3045_v33 = vunpack.i.l.bf16 %v3044_v3  ;;  %v1563_v45 = vsel %vm1542_vm13, %v1537_v38, %v3040_v58  ;;  %v1564_v29 = vsel %vm1542_vm13, %v1538_v0, %v3041_v14 }
 0x215   :  { %v3049_v30 = vpop.permute.xlu0 %3048  ;;  %2520 = vmatmul.mubr.msk.bf16.gmra.mrb[44].mxu1 %vm1643_vm15, %v1602_v5 }
 0x216   :  { %v3051_v39 = vunpack.i.h.bf16 %v3049_v30  ;;  %v3050_v12 = vunpack.i.l.bf16 %v3049_v30  ;;  %2523 = vmatprep.mubr.msk.bf16.mxu1 %vm3129_vm7, %v5362_v59  ;;  %v1589_v27 = vsel %vm1568_vm14, %v1563_v45, %v3045_v33  ;;  %v1590_v60 = vsel %vm1568_vm14, %v1564_v29, %v3046_v62 }
 0x217   :  { %v3054_v26 = vpop.permute.xlu1 %3053  ;;  %v1604_v16 = vpack.c.bf16 %v1590_v60, %v1589_v27 }
 0x218   :  { %v3056_v43 = vunpack.i.h.bf16 %v3054_v26  ;;  %v3055_v57 = vunpack.i.l.bf16 %v3054_v26  ;;  %v1411_v5 = vsel %vm1387_vm8, %v4396_v22, %v3051_v39  ;;  %v1410_v42 = vsel %vm1387_vm8, %v3906_v23, %v3050_v12 }
 0x219   :  { %v3059_v49 = vpop.permute.xlu0 %3058 }
 0x21a   :  { %v3061_v24 = vunpack.i.h.bf16 %v3059_v49  ;;  %v3060_v46 = vunpack.i.l.bf16 %v3059_v49  ;;  %v1436_v22 = vsel %vm1413_vm9, %v1410_v42, %v3055_v57  ;;  %v1437_v52 = vsel %vm1413_vm9, %v1411_v5, %v3056_v43  ;;  %v4838_v43 = vld [vmem:[%s5273_s7] ss:$0 sm:$0xff] }
 0x21b   :  { %v3064_v55 = vpop.permute.xlu1 %3063 }
 0x21c   :  { %v3066_v15 = vunpack.i.h.bf16 %v3064_v55  ;;  %v3065_v28 = vunpack.i.l.bf16 %v3064_v55  ;;  %v1462_v63 = vsel %vm1439_vm10, %v1436_v22, %v3060_v46  ;;  %v1463_v7 = vsel %vm1439_vm10, %v1437_v52, %v3061_v24  ;;  %v4833_v55 = vld [vmem:[%s5272_s6] ss:$0 sm:$0xff] }
 0x21d   :  { %v3069_v23 = vpop.permute.xlu0 %3068  ;;  %2524 = vmatmul.mubr.msk.bf16.gmra.mrb[48].mxu1 %vm1643_vm15, %v1603_v53 }
 0x21e   :  { %v3071_v21 = vunpack.i.h.bf16 %v3069_v23  ;;  %v3070_v6 = vunpack.i.l.bf16 %v3069_v23  ;;  %2527 = vmatprep.mubr.msk.bf16.mxu1 %vm3129_vm7, %v5362_v59  ;;  %v1487_v31 = vsel %vm131_vm0, %v1462_v63, %v3065_v28  ;;  %v1488_v13 = vsel %vm131_vm0, %v1463_v7, %v3066_v15 }
 0x21f   :  { %v3074_v61 = vpop.permute.xlu1 %3073 }
 0x220   :  { %v3076_v25 = vunpack.i.h.bf16 %v3074_v61  ;;  %v3075_v18 = vunpack.i.l.bf16 %v3074_v61  ;;  %v1513_v54 = vsel %vm1490_vm11, %v1487_v31, %v3070_v6  ;;  %v1514_v2 = vsel %vm1490_vm11, %v1488_v13, %v3071_v21 }
 0x221   :  { %v3079_v9 = vpop.permute.xlu0 %3078 }
 0x222   :  { %v3081_v4 = vunpack.i.h.bf16 %v3079_v9  ;;  %v3080_v53 = vunpack.i.l.bf16 %v3079_v9  ;;  %v1539_v3 = vsel %vm1516_vm12, %v1513_v54, %v3075_v18  ;;  %v1540_v32 = vsel %vm1516_vm12, %v1514_v2, %v3076_v25 }
 0x223   :  { %v3084_v50 = vpop.permute.xlu1 %3083 }
 0x224   :  { %v3086_v19 = vunpack.i.h.bf16 %v3084_v50  ;;  %v3085_v51 = vunpack.i.l.bf16 %v3084_v50  ;;  %v1565_v34 = vsel %vm1542_vm13, %v1539_v3, %v3080_v53  ;;  %v1566_v17 = vsel %vm1542_vm13, %v1540_v32, %v3081_v4 }
 0x225   :  { %v570_v40 = vpop.permute.xlu0 %569  ;;  %2528 = vmatmul.mubr.msk.bf16.gmra.mrb[52].mxu1 %vm1643_vm15, %v1604_v16 }
 0x226   :  { %v1412_v20 = vsel %vm1387_vm8, %v4020_v8, %v570_v40  ;;  %2531 = vmatprep.mubr.msk.bf16.mxu1 %vm3129_vm7, %v5362_v59  ;;  %v1591_v1 = vsel %vm1568_vm14, %v1565_v34, %v3085_v51  ;;  %v1592_v26 = vsel %vm1568_vm14, %v1566_v17, %v3086_v19 }
 0x227   :  { %v697_v36 = vpop.permute.xlu1 %696  ;;  %v1605_v12 = vpack.c.bf16 %v1592_v26, %v1591_v1 }
 0x228   :  { %v1438_v10 = vsel %vm1413_vm9, %v1412_v20, %v697_v36 }
 0x229   :  { %v775_v48 = vpop.permute.xlu0 %774 }
 0x22a   :  { %v1464_v30 = vsel %vm1439_vm10, %v1438_v10, %v775_v48 }
 0x22b   :  { %v902_v41 = vpop.permute.xlu1 %901 }
 0x22c   :  { %v1489_v11 = vsel %vm131_vm0, %v1464_v30, %v902_v41 }
 0x22d   :  { %v1029_v8 = vpop.permute.xlu0 %1028  ;;  %2532 = vmatmul.mubr.msk.bf16.gmra.mrb[56].mxu1 %vm1643_vm15, %v1605_v12 }
 0x22e   :  { %v1515_v35 = vsel %vm1490_vm11, %v1489_v11, %v1029_v8  ;;  %2535 = vmatprep.mubr.msk.bf16.mxu1 %vm3129_vm7, %v5362_v59 }
 0x22f   :  { %v1107_v39 = vpop.permute.xlu1 %1106 }
 0x230   :  { %v1541_v47 = vsel %vm1516_vm12, %v1515_v35, %v1107_v39 }
 0x231   :  { %v1234_v37 = vpop.permute.xlu0 %1233 }
 0x232   :  { %v1567_v44 = vsel %vm1542_vm13, %v1541_v47, %v1234_v37  ;;  %v3095_v37 = vld [vmem:[%s5266_s0 + $0x10] sm:$0xff] }
 0x233   :  { %v1361_v56 = vpop.permute.xlu1 %1360 }
 0x234   :  { %v1593_v14 = vsel %vm1568_vm14, %v1567_v44, %v1361_v56  ;;  %v3094_v56 = vld [vmem:[%s5266_s0 + $0x8] sm:$0xff]  ;;  %v2190_v44 = vrot.slane %v3095_v37, 3 }
 0x235   :  { %v1606_v58 = vpack.c.bf16 %v1593_v14, %v1593_v14  ;;  %v2189_v47 = vrot.slane %v3094_v56, 3 }
 0x237   :  { %2536 = vmatmul.mubr.msk.bf16.gmra.mrb[60].mxu1 %vm1643_vm15, %v1606_v58  ;;  %v4882_v14 = vsel %vm801_vm3, %v2189_v47, %v2190_v44  ;;  %v3096_v58 = vld [vmem:[%s5266_s0 + $0x18] sm:$0xff] }
 0x25a   :  { %v1720_v57 = vpop.f32.mrb[12].mxu1 }
 0x25b   :  { %v1828_v49 = vmul.f32 %v4833_v55, %v1720_v57  ;;  %v2489_v5 = vpop.f32.mrb[13].mxu1  ;;  %v2192_v57 = vrot.slane %v3096_v58, 3 }
 0x25c   :  { %v1723_v42 = vpop.f32.mrb[14].mxu1 }
 0x25d   :  { %v1859_v24 = vadd.f32 %v4838_v43, %v1828_v49  ;;  %v1829_v46 = vmul.f32 %v4833_v55, %v1723_v42  ;;  %v2490_v38 = vpop.f32.mrb[15].mxu1  ;;  %v4888_v49 = vsel %vm801_vm3, %v2190_v44, %v2192_v57 }
 0x25f   :  { %v1860_v0 = vadd.f32 %v4838_v43, %v1829_v46  ;;  %v1884_v62 = vmax.f32 %v1859_v24, 0.0 }
 0x261   :  { %v1885_v33 = vmax.f32 %v1860_v0, 0.0 }
 0x263   :  { %v1909_v45 = vpack.c.bf16 %v1885_v33, %v1884_v62 }
 0x265   :  { %2542 = vmatmul.mubr.msk.bf16.vlgmr.msra.gmra.mrb[16].mxu0 %vm1387_vm8, %v1909_v45  ;;  %v3097_v45 = vld [vmem:[%s5266_s0 + $0x20] sm:$0xff] }
 0x266   :  { %2545 = vmatprep.mubr.msk.bf16.mxu0 %vm3129_vm7, %v5362_v59 }
 0x274   :  { %v1728_v29 = vpop.f32.mrb[16].mxu1 }
 0x275   :  { %v1830_v61 = vmul.f32 %v4833_v55, %v1728_v29  ;;  %v2493_v15 = vpop.f32.mrb[17].mxu1  ;;  %v2194_v29 = vrot.slane %v3097_v45, 3 }
 0x276   :  { %v1731_v28 = vpop.f32.mrb[18].mxu1 }
 0x277   :  { %v1861_v22 = vadd.f32 %v4838_v43, %v1830_v61  ;;  %v1831_v52 = vmul.f32 %v4833_v55, %v1731_v28  ;;  %v2494_v23 = vpop.f32.mrb[19].mxu1 }
 0x279   :  { %v1862_v63 = vadd.f32 %v4838_v43, %v1831_v52  ;;  %v1886_v7 = vmax.f32 %v1861_v22, 0.0  ;;  %v4899_v22 = vsel %vm801_vm3, %v2192_v57, %v2194_v29  ;;  %v3098_v52 = vld [vmem:[%s5266_s0 + $0x28] sm:$0xff] }
 0x27a   :  { %v2196_v23 = vrot.slane %v3098_v52, 3 }
 0x27b   :  { %v1887_v21 = vmax.f32 %v1862_v63, 0.0 }
 0x27d   :  { %v1910_v6 = vpack.c.bf16 %v1887_v21, %v1886_v7 }
 0x27f   :  { %2546 = vmatmul.mubr.msk.bf16.gmra.mrb[20].mxu0 %vm1387_vm8, %v1910_v6 }
 0x280   :  { %2549 = vmatprep.mubr.msk.bf16.mxu0 %vm3129_vm7, %v5362_v59 }
 0x288   :  { %v1736_v50 = vpop.f32.mrb[20].mxu1 }
 0x289   :  { %v1832_v27 = vmul.f32 %v4833_v55, %v1736_v50  ;;  %v2497_v60 = vpop.f32.mrb[21].mxu1 }
 0x28a   :  { %v1739_v25 = vpop.f32.mrb[22].mxu1 }
 0x28b   :  { %v1863_v18 = vadd.f32 %v4838_v43, %v1832_v27  ;;  %v1833_v31 = vmul.f32 %v4833_v55, %v1739_v25  ;;  %v2498_v13 = vpop.f32.mrb[23].mxu1  ;;  %v4910_v25 = vsel %vm801_vm3, %v2194_v29, %v2196_v23 }
 0x28d   :  { %v1864_v9 = vadd.f32 %v4838_v43, %v1833_v31  ;;  %v1888_v54 = vmax.f32 %v1863_v18, 0.0 }
 0x28f   :  { %v1889_v2 = vmax.f32 %v1864_v9, 0.0 }
 0x291   :  { %v1911_v4 = vpack.c.bf16 %v1889_v2, %v1888_v54 }
 0x293   :  { %2550 = vmatmul.mubr.msk.bf16.gmra.mrb[24].mxu0 %vm1387_vm8, %v1911_v4 }
 0x294   :  { %2553 = vmatprep.mubr.msk.bf16.mxu0 %vm3129_vm7, %v5362_v59 }
 0x298   :  { %v1744_v53 = vpop.f32.mrb[24].mxu1 }
 0x299   :  { %v1834_v36 = vmul.f32 %v4833_v55, %v1744_v53  ;;  %v2501_v16 = vpop.f32.mrb[25].mxu1 }
 0x29a   :  { %v1747_v19 = vpop.f32.mrb[26].mxu1 }
 0x29b   :  { %v1865_v51 = vadd.f32 %v4838_v43, %v1834_v36  ;;  %v1835_v3 = vmul.f32 %v4833_v55, %v1747_v19  ;;  %v2502_v32 = vpop.f32.mrb[27].mxu1 }
 0x29d   :  { %v1866_v40 = vadd.f32 %v4838_v43, %v1835_v3  ;;  %v1890_v34 = vmax.f32 %v1865_v51, 0.0  ;;  %v3099_v3 = vld [vmem:[%s5266_s0 + $0x30] sm:$0xff] }
 0x29e   :  { %v2198_v32 = vrot.slane %v3099_v3, 3 }
 0x29f   :  { %v1891_v17 = vmax.f32 %v1866_v40, 0.0 }
 0x2a1   :  { %v1912_v20 = vpack.c.bf16 %v1891_v17, %v1890_v34 }
 0x2a3   :  { %2554 = vmatmul.mubr.msk.bf16.gmra.mrb[28].mxu0 %vm1387_vm8, %v1912_v20 }
 0x2a4   :  { %2557 = vmatprep.mubr.msk.bf16.mxu0 %vm3129_vm7, %v5362_v59 }
 0x2a8   :  { %v1752_v41 = vpop.f32.mrb[28].mxu1 }
 0x2a9   :  { %v1836_v10 = vmul.f32 %v4833_v55, %v1752_v41  ;;  %v2505_v48 = vpop.f32.mrb[29].mxu1 }
 0x2aa   :  { %v1755_v1 = vpop.f32.mrb[30].mxu1 }
 0x2ab   :  { %v1867_v26 = vadd.f32 %v4838_v43, %v1836_v10  ;;  %v1837_v30 = vmul.f32 %v4833_v55, %v1755_v1  ;;  %v2506_v39 = vpop.f32.mrb[31].mxu1 }
 0x2ac   :  { %v4928_v39 = vsel %vm801_vm3, %v2196_v23, %v2198_v32 }
 0x2ad   :  { %v1868_v12 = vadd.f32 %v4838_v43, %v1837_v30  ;;  %v1892_v11 = vmax.f32 %v1867_v26, 0.0 }
 0x2af   :  { %v1893_v8 = vmax.f32 %v1868_v12, 0.0  ;;  %v3100_v12 = vld [vmem:[%s5266_s0 + $0x38] sm:$0xff] }
 0x2b1   :  { %v1913_v35 = vpack.c.bf16 %v1893_v8, %v1892_v11  ;;  %v2200_v11 = vrot.slane %v3100_v12, 3 }
 0x2b3   :  { %2558 = vmatmul.mubr.msk.bf16.gmra.mrb[32].mxu0 %vm1387_vm8, %v1913_v35  ;;  %v4938_v57 = vsel %vm801_vm3, %v2198_v32, %v2200_v11 }
 0x2b4   :  { %2561 = vmatprep.mubr.msk.bf16.mxu0 %vm3129_vm7, %v5362_v59 }
 0x2c9   :  { %v1760_v5 = vpop.f32.mrb[32].mxu1 }
 0x2ca   :  { %v1838_v42 = vmul.f32 %v4833_v55, %v1760_v5  ;;  %v2509_v24 = vpop.f32.mrb[33].mxu1 }
 0x2cb   :  { %v1763_v46 = vpop.f32.mrb[34].mxu1 }
 0x2cc   :  { %v1869_v38 = vadd.f32 %v4838_v43, %v1838_v42  ;;  %v1839_v0 = vmul.f32 %v4833_v55, %v1763_v46  ;;  %v2510_v62 = vpop.f32.mrb[35].mxu1 }
 0x2ce   :  { %v1870_v33 = vadd.f32 %v4838_v43, %v1839_v0  ;;  %v1894_v61 = vmax.f32 %v1869_v38, 0.0  ;;  %v3101_v0 = vld [vmem:[%s5266_s0 + $0x40] sm:$0xff] }
 0x2cf   :  { %v2202_v62 = vrot.slane %v3101_v0, 3 }
 0x2d0   :  { %v1895_v15 = vmax.f32 %v1870_v33, 0.0 }
 0x2d2   :  { %v1914_v28 = vpack.c.bf16 %v1895_v15, %v1894_v61 }
 0x2d4   :  { %2562 = vmatmul.mubr.msk.bf16.gmra.mrb[36].mxu0 %vm1387_vm8, %v1914_v28 }
 0x2d5   :  { %2565 = vmatprep.mubr.msk.bf16.mxu0 %vm3129_vm7, %v5362_v59 }
 0x2d8   :  { %v1768_v63 = vpop.f32.mrb[36].mxu1 }
 0x2d9   :  { %v1840_v7 = vmul.f32 %v4833_v55, %v1768_v63  ;;  %v2513_v21 = vpop.f32.mrb[37].mxu1 }
 0x2da   :  { %v1771_v6 = vpop.f32.mrb[38].mxu1  ;;  %v4954_v21 = vsel %vm801_vm3, %v2200_v11, %v2202_v62 }
 0x2db   :  { %v1871_v50 = vadd.f32 %v4838_v43, %v1840_v7  ;;  %v1841_v27 = vmul.f32 %v4833_v55, %v1771_v6  ;;  %v2514_v60 = vpop.f32.mrb[39].mxu1  ;;  %v3102_v6 = vld [vmem:[%s5266_s0 + $0x48] sm:$0xff] }
 0x2dd   :  { %v1872_v18 = vadd.f32 %v4838_v43, %v1841_v27  ;;  %v1896_v31 = vmax.f32 %v1871_v50, 0.0  ;;  %v2204_v50 = vrot.slane %v3102_v6, 3 }
 0x2df   :  { %v1897_v13 = vmax.f32 %v1872_v18, 0.0 }
 0x2e0   :  { %v1776_v9 = vpop.f32.mrb[40].mxu1 }
 0x2e1   :  { %v1915_v54 = vpack.c.bf16 %v1897_v13, %v1896_v31  ;;  %v1842_v2 = vmul.f32 %v4833_v55, %v1776_v9  ;;  %v2517_v4 = vpop.f32.mrb[41].mxu1 }
 0x2e2   :  { %v1779_v53 = vpop.f32.mrb[42].mxu1 }
 0x2e3   :  { %v1873_v36 = vadd.f32 %v4838_v43, %v1842_v2  ;;  %v1843_v16 = vmul.f32 %v4833_v55, %v1779_v53  ;;  %v2518_v19 = vpop.f32.mrb[43].mxu1  ;;  %2566 = vmatmul.mubr.msk.bf16.gmra.mrb[40].mxu0 %vm1387_vm8, %v1915_v54  ;;  %v4964_v2 = vsel %vm801_vm3, %v2202_v62, %v2204_v50 }
 0x2e4   :  { %2569 = vmatprep.mubr.msk.bf16.mxu0 %vm3129_vm7, %v5362_v59 }
 0x2e5   :  { %v1874_v51 = vadd.f32 %v4838_v43, %v1843_v16  ;;  %v1898_v40 = vmax.f32 %v1873_v36, 0.0 }
 0x2e7   :  { %v1899_v34 = vmax.f32 %v1874_v51, 0.0  ;;  %v3103_v51 = vld [vmem:[%s5266_s0 + $0x50] sm:$0xff] }
 0x2e8   :  { %v1784_v17 = vpop.f32.mrb[44].mxu1  ;;  %v2206_v3 = vrot.slane %v3103_v51, 3 }
 0x2e9   :  { %v1916_v20 = vpack.c.bf16 %v1899_v34, %v1898_v40  ;;  %v1844_v41 = vmul.f32 %v4833_v55, %v1784_v17  ;;  %v2521_v10 = vpop.f32.mrb[45].mxu1 }
 0x2ea   :  { %v1787_v48 = vpop.f32.mrb[46].mxu1 }
 0x2eb   :  { %v1875_v1 = vadd.f32 %v4838_v43, %v1844_v41  ;;  %v1845_v26 = vmul.f32 %v4833_v55, %v1787_v48  ;;  %v2522_v30 = vpop.f32.mrb[47].mxu1  ;;  %2570 = vmatmul.mubr.msk.bf16.gmra.mrb[44].mxu0 %vm1387_vm8, %v1916_v20 }
 0x2ec   :  { %2573 = vmatprep.mubr.msk.bf16.mxu0 %vm3129_vm7, %v5362_v59  ;;  %v3104_v30 = vld [vmem:[%s5266_s0 + $0x58] sm:$0xff] }
 0x2ed   :  { %v1876_v8 = vadd.f32 %v4838_v43, %v1845_v26  ;;  %v1900_v35 = vmax.f32 %v1875_v1, 0.0  ;;  %v4979_v26 = vsel %vm801_vm3, %v2204_v50, %v2206_v3  ;;  %v2208_v12 = vrot.slane %v3104_v30, 3 }
 0x2ef   :  { %v1901_v56 = vmax.f32 %v1876_v8, 0.0  ;;  %v4987_v8 = vsel %vm801_vm3, %v2206_v3, %v2208_v12  ;;  %v3114_v3 = vld [vmem:[%s5266_s0 + $0xa8] sm:$0xff] }
 0x2f0   :  { %v1792_v47 = vpop.f32.mrb[48].mxu1 }
 0x2f1   :  { %v1917_v37 = vpack.c.bf16 %v1901_v56, %v1900_v35  ;;  %v1846_v44 = vmul.f32 %v4833_v55, %v1792_v47  ;;  %v2525_v58 = vpop.f32.mrb[49].mxu1 }
 0x2f2   :  { %v1795_v5 = vpop.f32.mrb[50].mxu1 }
 0x2f3   :  { %v1877_v42 = vadd.f32 %v4838_v43, %v1846_v44  ;;  %v1847_v24 = vmul.f32 %v4833_v55, %v1795_v5  ;;  %v2526_v46 = vpop.f32.mrb[51].mxu1  ;;  %2574 = vmatmul.mubr.msk.bf16.gmra.mrb[48].mxu0 %vm1387_vm8, %v1917_v37  ;;  %v3107_v44 = vld [vmem:[%s5266_s0 + $0x70] sm:$0xff]  ;;  %v5008_v5 = vld [vmem:[%s5274_s9] ss:$0 sm:$0xff] }
 0x2f4   :  { %2577 = vmatprep.mubr.msk.bf16.mxu0 %vm3129_vm7, %v5362_v59  ;;  %v2214_v58 = vrot.slane %v3107_v44, 3  ;;  %v3117_v44 = vld [vmem:[%s5266_s0 + $0xc0] sm:$0xff] }
 0x2f5   :  { %v1878_v38 = vadd.f32 %v4838_v43, %v1847_v24  ;;  %v1902_v33 = vmax.f32 %v1877_v42, 0.0  ;;  %v5013_v42 = vld [vmem:[%s5275_s10] ss:$0 sm:$0xff] }
 0x2f7   :  { %v1903_v45 = vmax.f32 %v1878_v38, 0.0 }
 0x2f8   :  { %v1800_v29 = vpop.f32.mrb[52].mxu1 }
 0x2f9   :  { %v1918_v61 = vpack.c.bf16 %v1903_v45, %v1902_v33  ;;  %v1848_v15 = vmul.f32 %v4833_v55, %v1800_v29  ;;  %v2529_v28 = vpop.f32.mrb[53].mxu1  ;;  %v3108_v33 = vld [vmem:[%s5266_s0 + $0x78] sm:$0xff] }
 0x2fa   :  { %v1803_v52 = vpop.f32.mrb[54].mxu1  ;;  %v2216_v45 = vrot.slane %v3108_v33, 3  ;;  %v3109_v28 = vld [vmem:[%s5266_s0 + $0x80] sm:$0xff] }
 0x2fb   :  { %v1879_v23 = vadd.f32 %v4838_v43, %v1848_v15  ;;  %v1849_v63 = vmul.f32 %v4833_v55, %v1803_v52  ;;  %v2530_v7 = vpop.f32.mrb[55].mxu1  ;;  %2578 = vmatmul.mubr.msk.bf16.gmra.mrb[52].mxu0 %vm1387_vm8, %v1918_v61  ;;  %v2218_v52 = vrot.slane %v3109_v28, 3 }
 0x2fc   :  { %2581 = vmatprep.mubr.msk.bf16.mxu0 %vm3129_vm7, %v5362_v59  ;;  %v5031_v50 = vsel %vm801_vm3, %v2214_v58, %v2216_v45 }
 0x2fd   :  { %v1880_v27 = vadd.f32 %v4838_v43, %v1849_v63  ;;  %v1904_v60 = vmax.f32 %v1879_v23, 0.0 }
 0x2ff   :  { %v1905_v18 = vmax.f32 %v1880_v27, 0.0 }
 0x300   :  { %v1808_v31 = vpop.f32.mrb[56].mxu1 }
 0x301   :  { %v1919_v13 = vpack.c.bf16 %v1905_v18, %v1904_v60  ;;  %v1850_v9 = vmul.f32 %v4833_v55, %v1808_v31  ;;  %v2533_v54 = vpop.f32.mrb[57].mxu1  ;;  %v5038_v60 = vsel %vm801_vm3, %v2216_v45, %v2218_v52 }
 0x302   :  { %v1811_v4 = vpop.f32.mrb[58].mxu1  ;;  %v3112_v54 = vld [vmem:[%s5266_s0 + $0x98] sm:$0xff] }
 0x303   :  { %v1881_v53 = vadd.f32 %v4838_v43, %v1850_v9  ;;  %v1851_v36 = vmul.f32 %v4833_v55, %v1811_v4  ;;  %v2534_v16 = vpop.f32.mrb[59].mxu1  ;;  %2582 = vmatmul.mubr.msk.bf16.gmra.mrb[56].mxu0 %vm1387_vm8, %v1919_v13  ;;  %v2224_v4 = vrot.slane %v3112_v54, 3 }
 0x304   :  { %2585 = vmatprep.mubr.msk.bf16.mxu0 %vm3129_vm7, %v5362_v59 }
 0x305   :  { %v1882_v19 = vadd.f32 %v4838_v43, %v1851_v36  ;;  %v1906_v32 = vmax.f32 %v1881_v53, 0.0  ;;  %v3113_v53 = vld [vmem:[%s5266_s0 + $0xa0] sm:$0xff] }
 0x306   :  { %v2226_v36 = vrot.slane %v3113_v53, 3 }
 0x307   :  { %v1907_v40 = vmax.f32 %v1882_v19, 0.0 }
 0x308   :  { %v5066_v19 = vsel %vm801_vm3, %v2224_v4, %v2226_v36 }
 0x309   :  { %v1920_v17 = vpack.c.bf16 %v1907_v40, %v1906_v32  ;;  %v2228_v32 = vrot.slane %v3114_v3, 3 }
 0x30a   :  { %v1816_v34 = vpop.f32.mrb[60].mxu1 }
 0x30b   :  { %v1852_v20 = vmul.f32 %v4833_v55, %v1816_v34  ;;  %v2537_v41 = vpop.f32.mrb[61].mxu1  ;;  %2586 = vmatmul.mubr.msk.bf16.gmra.mrb[60].mxu0 %vm1387_vm8, %v1920_v17 }
 0x30c   :  { %v1819_v10 = vpop.f32.mrb[62].mxu1  ;;  %2589 = vmatprep.mubr.msk.bf16.mxu0 %vm3129_vm7, %v5362_v59  ;;  %v3106_v59 = vld [vmem:[%s5266_s0 + $0x68] sm:$0xff] }
 0x30d   :  { %v1883_v48 = vadd.f32 %v4838_v43, %v1852_v20  ;;  %v2538_v1 = vpop.f32.mrb[63].mxu1  ;;  %v3105_v43 = vld [vmem:[%s5266_s0 + $0x60] sm:$0xff]  ;;  %v2212_v47 = vrot.slane %v3106_v59, 3  ;;  %v3115_v20 = vld [vmem:[%s5266_s0 + $0xb0] sm:$0xff]  ;;  %v3116_v59 = vld [vmem:[%s5266_s0 + $0xb8] sm:$0xff] }
 0x30e   :  { %v2210_v35 = vrot.slane %v3105_v43, 3  ;;  %v2230_v41 = vrot.slane %v3115_v20, 3 }
 0x30f   :  { %v1908_v11 = vmax.f32 %v1883_v48, 0.0  ;;  %v5017_v0 = vsel %vm801_vm3, %v2212_v47, %v2214_v58  ;;  %v2234_v58 = vrot.slane %v3117_v44, 3 }
 0x310   :  { %v4994_v56 = vsel %vm801_vm3, %v2208_v12, %v2210_v35  ;;  %v5000_v37 = vsel %vm801_vm3, %v2210_v35, %v2212_v47  ;;  %v5084_v35 = vsel %vm801_vm3, %v2228_v32, %v2230_v41  ;;  %v2232_v47 = vrot.slane %v3116_v59, 3 }
 0x311   :  { %v1921_v55 = vpack.c.bf16 %v1908_v11, %v1908_v11  ;;  %v5080_v11 = vsel %vm801_vm3, %v2226_v36, %v2228_v32 }
 0x313   :  { %2590 = vmatmul.mubr.msk.bf16.gmra.mrb[64].mxu0 %vm1387_vm8, %v1921_v55 }
 0x338   :  { %v1999_v24 = vpop.f32.mrb[16].mxu0 }
 0x339   :  { %v2107_v46 = vmul.f32 %v5008_v5, %v1999_v24  ;;  %v2543_v38 = vpop.f32.mrb[17].mxu0  ;;  %v5104_v24 = vsel %vm801_vm3, %v2232_v47, %v2234_v58 }
 0x33a   :  { %v2002_v62 = vpop.f32.mrb[18].mxu0 }
 0x33b   :  { %v2138_v29 = vadd.f32 %v5013_v42, %v2107_v46  ;;  %v2108_v61 = vmul.f32 %v5008_v5, %v2002_v62  ;;  %v2544_v15 = vpop.f32.mrb[19].mxu0  ;;  %v3118_v46 = vld [vmem:[%s5266_s0 + $0xc8] sm:$0xff]  ;;  %v3119_v62 = vld [vmem:[%s5266_s0 + $0xd0] sm:$0xff] }
 0x33c   :  { %v2236_v38 = vrot.slane %v3118_v46, 3  ;;  %v2238_v33 = vrot.slane %v3119_v62, 3 }
 0x33d   :  { %v2265_v23 = vadd.f32 %v4882_v14, %v2138_v29  ;;  %v2139_v63 = vadd.f32 %v5013_v42, %v2108_v61  ;;  %v3110_v14 = vld [vmem:[%s5266_s0 + $0x88] sm:$0xff] }
 0x33e   :  { %v2220_v18 = vrot.slane %v3110_v14, 3  ;;  %v5113_v45 = vsel %vm801_vm3, %v2234_v58, %v2236_v38  ;;  %v5117_v28 = vsel %vm801_vm3, %v2236_v38, %v2238_v33 }
 0x33f   :  { %v2290_v7 = vmax.f32 %v2265_v23, 0.0  ;;  %v2266_v6 = vadd.f32 %v4888_v49, %v2139_v63  ;;  %v3111_v49 = vld [vmem:[%s5266_s0 + $0x90] sm:$0xff] }
 0x340   :  { %v2222_v31 = vrot.slane %v3111_v49, 3  ;;  %v5051_v13 = vsel %vm801_vm3, %v2218_v52, %v2220_v18 }
 0x341   :  { %2315 = vst.msk [vmem:[%s5276_s11] sm:$0xff] %vm131_vm0, %v2290_v7  ;;  %v2291_v27 = vmax.f32 %v2266_v6, 0.0 }
 0x342   :  { %v5054_v9 = vsel %vm801_vm3, %v2220_v18, %v2222_v31  ;;  %v5063_v16 = vsel %vm801_vm3, %v2222_v31, %v2224_v4 }
 0x343   :  { %2316 = vst.msk [vmem:[%s5276_s11 + $0x8] sm:$0xff] %vm131_vm0, %v2291_v27 }
 0x352   :  { %v2007_v51 = vpop.f32.mrb[20].mxu0 }
 0x353   :  { %v2109_v40 = vmul.f32 %v5008_v5, %v2007_v51  ;;  %v2547_v34 = vpop.f32.mrb[21].mxu0 }
 0x354   :  { %v2010_v17 = vpop.f32.mrb[22].mxu0 }
 0x355   :  { %v2140_v10 = vadd.f32 %v5013_v42, %v2109_v40  ;;  %v2110_v48 = vmul.f32 %v5008_v5, %v2010_v17  ;;  %v2548_v1 = vpop.f32.mrb[23].mxu0 }
 0x357   :  { %v2267_v30 = vadd.f32 %v4899_v22, %v2140_v10  ;;  %v2141_v12 = vadd.f32 %v5013_v42, %v2110_v48 }
 0x359   :  { %v2292_v55 = vmax.f32 %v2267_v30, 0.0  ;;  %v2268_v43 = vadd.f32 %v4910_v25, %v2141_v12  ;;  %v5101_v25 = vsel %vm801_vm3, %v2230_v41, %v2232_v47 }
 0x35b   :  { %2317 = vst.msk [vmem:[%s5276_s11 + $0x10] sm:$0xff] %vm131_vm0, %v2292_v55  ;;  %v2293_v22 = vmax.f32 %v2268_v43, 0.0 }
 0x35d   :  { %2318 = vst.msk [vmem:[%s5276_s11 + $0x18] sm:$0xff] %vm131_vm0, %v2293_v22 }
 0x366   :  { %v2015_v29 = vpop.f32.mrb[24].mxu0 }
 0x367   :  { %v2111_v61 = vmul.f32 %v5008_v5, %v2015_v29  ;;  %v2551_v15 = vpop.f32.mrb[25].mxu0 }
 0x368   :  { %v2018_v52 = vpop.f32.mrb[26].mxu0 }
 0x369   :  { %v2142_v23 = vadd.f32 %v5013_v42, %v2111_v61  ;;  %v2112_v63 = vmul.f32 %v5008_v5, %v2018_v52  ;;  %v2552_v7 = vpop.f32.mrb[27].mxu0 }
 0x36b   :  { %v2269_v6 = vadd.f32 %v4928_v39, %v2142_v23  ;;  %v2143_v27 = vadd.f32 %v5013_v42, %v2112_v63 }
 0x36d   :  { %v2294_v14 = vmax.f32 %v2269_v6, 0.0  ;;  %v2270_v18 = vadd.f32 %v4938_v57, %v2143_v27 }
 0x36f   :  { %2319 = vst.msk [vmem:[%s5276_s11 + $0x20] sm:$0xff] %vm131_vm0, %v2294_v14  ;;  %v2295_v49 = vmax.f32 %v2270_v18, 0.0 }
 0x371   :  { %2320 = vst.msk [vmem:[%s5276_s11 + $0x28] sm:$0xff] %vm131_vm0, %v2295_v49 }
 0x376   :  { %v2023_v31 = vpop.f32.mrb[28].mxu0 }
 0x377   :  { %v2113_v54 = vmul.f32 %v5008_v5, %v2023_v31  ;;  %v2555_v39 = vpop.f32.mrb[29].mxu0 }
 0x378   :  { %v2026_v4 = vpop.f32.mrb[30].mxu0 }
 0x379   :  { %v2144_v53 = vadd.f32 %v5013_v42, %v2113_v54  ;;  %v2114_v57 = vmul.f32 %v5008_v5, %v2026_v4  ;;  %v2556_v36 = vpop.f32.mrb[31].mxu0 }
 0x37b   :  { %v2271_v51 = vadd.f32 %v4954_v21, %v2144_v53  ;;  %v2145_v3 = vadd.f32 %v5013_v42, %v2114_v57 }
 0x37d   :  { %v2296_v32 = vmax.f32 %v2271_v51, 0.0  ;;  %v2272_v40 = vadd.f32 %v4964_v2, %v2145_v3 }
 0x37f   :  { %2321 = vst.msk [vmem:[%s5276_s11 + $0x30] sm:$0xff] %vm131_vm0, %v2296_v32  ;;  %v2297_v34 = vmax.f32 %v2272_v40, 0.0 }
 0x381   :  { %2322 = vst.msk [vmem:[%s5276_s11 + $0x38] sm:$0xff] %vm131_vm0, %v2297_v34 }
 0x386   :  { %v2031_v17 = vpop.f32.mrb[32].mxu0 }
 0x387   :  { %v2115_v20 = vmul.f32 %v5008_v5, %v2031_v17  ;;  %v2559_v21 = vpop.f32.mrb[33].mxu0 }
 0x388   :  { %v2034_v41 = vpop.f32.mrb[34].mxu0 }
 0x389   :  { %v2146_v10 = vadd.f32 %v5013_v42, %v2115_v20  ;;  %v2116_v2 = vmul.f32 %v5008_v5, %v2034_v41  ;;  %v2560_v48 = vpop.f32.mrb[35].mxu0 }
 0x38b   :  { %v2273_v1 = vadd.f32 %v4979_v26, %v2146_v10  ;;  %v2147_v30 = vadd.f32 %v5013_v42, %v2116_v2 }
 0x38d   :  { %v2298_v12 = vmax.f32 %v2273_v1, 0.0  ;;  %v2274_v55 = vadd.f32 %v4987_v8, %v2147_v30 }
 0x38f   :  { %2323 = vst.msk [vmem:[%s5276_s11 + $0x40] sm:$0xff] %vm131_vm0, %v2298_v12  ;;  %v2299_v43 = vmax.f32 %v2274_v55, 0.0 }
 0x391   :  { %2324 = vst.msk [vmem:[%s5276_s11 + $0x48] sm:$0xff] %vm131_vm0, %v2299_v43 }
 0x3a7   :  { %v2039_v59 = vpop.f32.mrb[36].mxu0 }
 0x3a8   :  { %v2117_v47 = vmul.f32 %v5008_v5, %v2039_v59  ;;  %v2563_v26 = vpop.f32.mrb[37].mxu0 }
 0x3a9   :  { %v2042_v22 = vpop.f32.mrb[38].mxu0 }
 0x3aa   :  { %v2148_v44 = vadd.f32 %v5013_v42, %v2117_v47  ;;  %v2118_v8 = vmul.f32 %v5008_v5, %v2042_v22  ;;  %v2564_v58 = vpop.f32.mrb[39].mxu0 }
 0x3ac   :  { %v2275_v46 = vadd.f32 %v4994_v56, %v2148_v44  ;;  %v2149_v38 = vadd.f32 %v5013_v42, %v2118_v8 }
 0x3ae   :  { %v2300_v62 = vmax.f32 %v2275_v46, 0.0  ;;  %v2276_v33 = vadd.f32 %v5000_v37, %v2149_v38 }
 0x3b0   :  { %2325 = vst.msk [vmem:[%s5276_s11 + $0x50] sm:$0xff] %vm131_vm0, %v2300_v62  ;;  %v2301_v29 = vmax.f32 %v2276_v33, 0.0 }
 0x3b2   :  { %2326 = vst.msk [vmem:[%s5276_s11 + $0x58] sm:$0xff] %vm131_vm0, %v2301_v29 }
 0x3b6   :  { %v2047_v61 = vpop.f32.mrb[40].mxu0 }
 0x3b7   :  { %v2119_v15 = vmul.f32 %v5008_v5, %v2047_v61  ;;  %v2567_v56 = vpop.f32.mrb[41].mxu0 }
 0x3b8   :  { %v2050_v52 = vpop.f32.mrb[42].mxu0 }
 0x3b9   :  { %v2150_v23 = vadd.f32 %v5013_v42, %v2119_v15  ;;  %v2120_v37 = vmul.f32 %v5008_v5, %v2050_v52  ;;  %v2568_v63 = vpop.f32.mrb[43].mxu0 }
 0x3bb   :  { %v2277_v7 = vadd.f32 %v5017_v0, %v2150_v23  ;;  %v2151_v6 = vadd.f32 %v5013_v42, %v2120_v37 }
 0x3bd   :  { %v2302_v27 = vmax.f32 %v2277_v7, 0.0  ;;  %v2278_v14 = vadd.f32 %v5031_v50, %v2151_v6 }
 0x3be   :  { %v2055_v18 = vpop.f32.mrb[44].mxu0 }
 0x3bf   :  { %2327 = vst.msk [vmem:[%s5276_s11 + $0x60] sm:$0xff] %vm131_vm0, %v2302_v27  ;;  %v2303_v49 = vmax.f32 %v2278_v14, 0.0  ;;  %v2121_v31 = vmul.f32 %v5008_v5, %v2055_v18  ;;  %v2571_v54 = vpop.f32.mrb[45].mxu0 }
 0x3c0   :  { %v2058_v39 = vpop.f32.mrb[46].mxu0 }
 0x3c1   :  { %2328 = vst.msk [vmem:[%s5276_s11 + $0x68] sm:$0xff] %vm131_vm0, %v2303_v49  ;;  %v2152_v0 = vadd.f32 %v5013_v42, %v2121_v31  ;;  %v2122_v50 = vmul.f32 %v5008_v5, %v2058_v39  ;;  %v2572_v4 = vpop.f32.mrb[47].mxu0 }
 0x3c3   :  { %v2279_v53 = vadd.f32 %v5038_v60, %v2152_v0  ;;  %v2153_v57 = vadd.f32 %v5013_v42, %v2122_v50 }
 0x3c5   :  { %v2304_v36 = vmax.f32 %v2279_v53, 0.0  ;;  %v2280_v51 = vadd.f32 %v5051_v13, %v2153_v57 }
 0x3c6   :  { %v2063_v3 = vpop.f32.mrb[48].mxu0 }
 0x3c7   :  { %2329 = vst.msk [vmem:[%s5276_s11 + $0x70] sm:$0xff] %vm131_vm0, %v2304_v36  ;;  %v2305_v32 = vmax.f32 %v2280_v51, 0.0  ;;  %v2123_v40 = vmul.f32 %v5008_v5, %v2063_v3  ;;  %v2575_v34 = vpop.f32.mrb[49].mxu0 }
 0x3c8   :  { %v2066_v17 = vpop.f32.mrb[50].mxu0 }
 0x3c9   :  { %2330 = vst.msk [vmem:[%s5276_s11 + $0x78] sm:$0xff] %vm131_vm0, %v2305_v32  ;;  %v2154_v60 = vadd.f32 %v5013_v42, %v2123_v40  ;;  %v2124_v13 = vmul.f32 %v5008_v5, %v2066_v17  ;;  %v2576_v20 = vpop.f32.mrb[51].mxu0 }
 0x3cb   :  { %v2281_v21 = vadd.f32 %v5054_v9, %v2154_v60  ;;  %v2155_v41 = vadd.f32 %v5013_v42, %v2124_v13 }
 0x3cd   :  { %v2306_v10 = vmax.f32 %v2281_v21, 0.0  ;;  %v2282_v2 = vadd.f32 %v5063_v16, %v2155_v41 }
 0x3ce   :  { %v2071_v48 = vpop.f32.mrb[52].mxu0 }
 0x3cf   :  { %2331 = vst.msk [vmem:[%s5276_s11 + $0x80] sm:$0xff] %vm131_vm0, %v2306_v10  ;;  %v2307_v1 = vmax.f32 %v2282_v2, 0.0  ;;  %v2125_v30 = vmul.f32 %v5008_v5, %v2071_v48  ;;  %v2579_v12 = vpop.f32.mrb[53].mxu0 }
 0x3d0   :  { %v2074_v55 = vpop.f32.mrb[54].mxu0 }
 0x3d1   :  { %2332 = vst.msk [vmem:[%s5276_s11 + $0x88] sm:$0xff] %vm131_vm0, %v2307_v1  ;;  %v2156_v9 = vadd.f32 %v5013_v42, %v2125_v30  ;;  %v2126_v16 = vmul.f32 %v5008_v5, %v2074_v55  ;;  %v2580_v43 = vpop.f32.mrb[55].mxu0 }
 0x3d3   :  { %v2283_v59 = vadd.f32 %v5066_v19, %v2156_v9  ;;  %v2157_v47 = vadd.f32 %v5013_v42, %v2126_v16 }
 0x3d5   :  { %v2308_v26 = vmax.f32 %v2283_v59, 0.0  ;;  %v2284_v22 = vadd.f32 %v5080_v11, %v2157_v47 }
 0x3d6   :  { %v2079_v44 = vpop.f32.mrb[56].mxu0 }
 0x3d7   :  { %2333 = vst.msk [vmem:[%s5276_s11 + $0x90] sm:$0xff] %vm131_vm0, %v2308_v26  ;;  %v2309_v8 = vmax.f32 %v2284_v22, 0.0  ;;  %v2127_v58 = vmul.f32 %v5008_v5, %v2079_v44  ;;  %v2583_v46 = vpop.f32.mrb[57].mxu0 }
 0x3d8   :  { %v2082_v38 = vpop.f32.mrb[58].mxu0 }
 0x3d9   :  { %2334 = vst.msk [vmem:[%s5276_s11 + $0x98] sm:$0xff] %vm131_vm0, %v2309_v8  ;;  %v2158_v19 = vadd.f32 %v5013_v42, %v2127_v58  ;;  %v2128_v11 = vmul.f32 %v5008_v5, %v2082_v38  ;;  %v2584_v62 = vpop.f32.mrb[59].mxu0 }
 0x3db   :  { %v2285_v33 = vadd.f32 %v5084_v35, %v2158_v19  ;;  %v2159_v29 = vadd.f32 %v5013_v42, %v2128_v11 }
 0x3dd   :  { %v2310_v61 = vmax.f32 %v2285_v33, 0.0  ;;  %v2286_v15 = vadd.f32 %v5101_v25, %v2159_v29 }
 0x3de   :  { %v2087_v56 = vpop.f32.mrb[60].mxu0 }
 0x3df   :  { %2335 = vst.msk [vmem:[%s5276_s11 + $0xa0] sm:$0xff] %vm131_vm0, %v2310_v61  ;;  %v2311_v52 = vmax.f32 %v2286_v15, 0.0  ;;  %v2129_v23 = vmul.f32 %v5008_v5, %v2087_v56  ;;  %v2587_v37 = vpop.f32.mrb[61].mxu0 }
 0x3e0   :  { %v2090_v63 = vpop.f32.mrb[62].mxu0 }
 0x3e1   :  { %2336 = vst.msk [vmem:[%s5276_s11 + $0xa8] sm:$0xff] %vm131_vm0, %v2311_v52  ;;  %v2160_v35 = vadd.f32 %v5013_v42, %v2129_v23  ;;  %v2130_v25 = vmul.f32 %v5008_v5, %v2090_v63  ;;  %v2588_v7 = vpop.f32.mrb[63].mxu0 }
 0x3e3   :  { %v2287_v6 = vadd.f32 %v5104_v24, %v2160_v35  ;;  %v2161_v27 = vadd.f32 %v5013_v42, %v2130_v25 }
 0x3e5   :  { %v2312_v14 = vmax.f32 %v2287_v6, 0.0  ;;  %v2288_v18 = vadd.f32 %v5113_v45, %v2161_v27 }
 0x3e6   :  { %v2095_v49 = vpop.f32.mrb[64].mxu0 }
 0x3e7   :  { %2337 = vst.msk [vmem:[%s5276_s11 + $0xb0] sm:$0xff] %vm131_vm0, %v2312_v14  ;;  %v2313_v31 = vmax.f32 %v2288_v18, 0.0  ;;  %v2131_v54 = vmul.f32 %v5008_v5, %v2095_v49  ;;  %v2591_v39 = vpop.f32.mrb[65].mxu0 }
 0x3e8   :  { %v2098_v0 = vpop.f32.mrb[66].mxu0 }
 0x3e9   :  { %2338 = vst.msk [vmem:[%s5276_s11 + $0xb8] sm:$0xff] %vm131_vm0, %v2313_v31  ;;  %v2162_v24 = vadd.f32 %v5013_v42, %v2131_v54  ;;  %v2592_v50 = vpop.f32.mrb[67].mxu0 }
 0x3eb   :  { %v2289_v45 = vadd.f32 %v5117_v28, %v2162_v24 }
 0x3ed   :  { %v2314_v4 = vmax.f32 %v2289_v45, 0.0 }
 0x3ef   :  { %2339 = vst.msk [vmem:[%s5276_s11 + $0xc0] sm:$0xff] %vm131_vm0, %v2314_v4 }

</bundles_post_ra>
